<compile_context>
chip_gen: v5e
topology: v5e:2x2
jax: 0.10.0
libtpu: 0.0.40
codegen_flags: <defaults>
</compile_context>

<pallas_src>
import functools

import jax
import jax.numpy as jnp
from jax.experimental import pallas as pl
from jax.experimental.pallas import tpu as pltpu

CPAD = 8        # xyz channels 3 -> padded to 8
HEAD_PAD = 64   # flattened 3x3 matrix 9 -> packed into a padded 8x8 (=64 lanes) layout
NT_MAX = 512    # points per grid tile (bounds peak activation to [512,1024] f32 = 2 MB)


def _vmem_limit_bytes():
    # v7x has only 64 MiB VMEM per TensorCore; derive an honourable limit everywhere.
    try:
        cap = pltpu.get_tpu_info().vmem_capacity_bytes
    except Exception:
        cap = 64 * 1024 * 1024
    return int(min(cap * 3 // 4, 96 * 1024 * 1024))


def _rep_spec(arr):
    """Full-array block replicated across the whole grid (weights / biases)."""
    zeros = (0,) * arr.ndim
    return pl.BlockSpec(arr.shape, lambda *_: zeros)


# ----------------------------------------------------------------------------
# Kernel A: TNet3 conv trunk — conv1/2/3 (+folded BN) + masked max, tiled over N.
# ----------------------------------------------------------------------------
def _tnet_trunk_kernel(x_ref, w1_ref, b1_ref, w2_ref, b2_ref, w3_ref, b3_ref,
                       out_ref, *, block_n, n_valid, apply_mask):
    nt = pl.program_id(1)

    @pl.when(nt == 0)
    def _init():
        out_ref[0] = jnp.full(out_ref.shape[1:], -jnp.inf, out_ref.dtype)

    x = x_ref[0]                                                        # [NT, CPAD] bf16
    h = jnp.maximum(jnp.dot(x, w1_ref[...], preferred_element_type=jnp.float32)
                    + b1_ref[...], 0.0).astype(jnp.bfloat16)
    h = jnp.maximum(jnp.dot(h, w2_ref[...], preferred_element_type=jnp.float32)
                    + b2_ref[...], 0.0).astype(jnp.bfloat16)
    h = jnp.maximum(jnp.dot(h, w3_ref[...], preferred_element_type=jnp.float32)
                    + b3_ref[...], 0.0)                                 # [NT, 1024] f32
    if apply_mask:
        row = jax.lax.broadcasted_iota(jnp.int32, (block_n, 1), 0) + nt * block_n
        h = jnp.where(row < n_valid, h, -jnp.inf)
    out_ref[0] = jnp.maximum(out_ref[0], jnp.max(h, axis=0, keepdims=True))


# ----------------------------------------------------------------------------
# Kernel B: TNet3 FC head — runs ONCE over the whole batch (M=B MXU rows).
# fc3 is pre-packed so the output is already the padded 8x8 transform layout.
# ----------------------------------------------------------------------------
def _tnet_head_kernel(g_ref, f1_ref, fb1_ref, f2_ref, fb2_ref, f3_ref, fb3_ref,
                      iden_ref, out_ref):
    g = g_ref[...]                                                      # [B, 1024] f32
    g = jnp.maximum(jnp.dot(g, f1_ref[...],
                            preferred_element_type=jnp.float32) + fb1_ref[...], 0.0)
    g = jnp.maximum(jnp.dot(g, f2_ref[...],
                            preferred_element_type=jnp.float32) + fb2_ref[...], 0.0)
    out_ref[...] = (jnp.dot(g, f3_ref[...], preferred_element_type=jnp.float32)
                    + fb3_ref[...] + iden_ref[...])                     # [B, 64]


# ----------------------------------------------------------------------------
# Kernel C: main trunk — T folded into conv1, conv2/conv3 (+folded BN), masked max.
# ----------------------------------------------------------------------------
def _main_trunk_kernel(x_ref, t_ref, w1_ref, b1_ref, w2_ref, b2_ref, w3_ref, b3_ref,
                       out_ref, *, block_n, n_valid, apply_mask):
    nt = pl.program_id(1)

    @pl.when(nt == 0)
    def _init():
        out_ref[0] = jnp.full(out_ref.shape[1:], -jnp.inf, out_ref.dtype)

    # Fold the 3x3 (padded 8x8) alignment transform into conv1: one tiny 8x8x64
    # matmul per grid step instead of an [NT,8]x[8,8] pass over every point.
    tw1 = jnp.dot(t_ref[0], w1_ref[...],
                  preferred_element_type=jnp.float32).astype(jnp.bfloat16)   # [8, 64]
    x = x_ref[0]                                                             # [NT, 8] bf16
    h = jnp.maximum(jnp.dot(x, tw1, preferred_element_type=jnp.float32)
                    + b1_ref[...], 0.0).astype(jnp.bfloat16)
    h = jnp.maximum(jnp.dot(h, w2_ref[...], preferred_element_type=jnp.float32)
                    + b2_ref[...], 0.0).astype(jnp.bfloat16)
    h = jnp.dot(h, w3_ref[...], preferred_element_type=jnp.float32) + b3_ref[...]  # bn3, NO relu
    if apply_mask:
        row = jax.lax.broadcasted_iota(jnp.int32, (block_n, 1), 0) + nt * block_n
        h = jnp.where(row < n_valid, h, -jnp.inf)
    out_ref[0] = jnp.maximum(out_ref[0], jnp.max(h, axis=0, keepdims=True))


# ----------------------------------------------------------------------------
# pallas_call wrappers
# ----------------------------------------------------------------------------
def tnet_pooled_pallas(x_pad16, KP, *, block_n, n_valid):
    B, n_pad, _ = x_pad16.shape
    n_tiles = n_pad // block_n
    w_args = [KP["tw1"], KP["tb1"], KP["tw2"], KP["tb2"], KP["tw3"], KP["tb3"]]
    kernel = functools.partial(_tnet_trunk_kernel, block_n=block_n, n_valid=n_valid,
                               apply_mask=(n_pad != n_valid))
    out = pl.pallas_call(
        kernel,
        out_shape=jax.ShapeDtypeStruct((B, 1, 1024), jnp.float32),
        grid=(B, n_tiles),
        in_specs=[pl.BlockSpec((1, block_n, CPAD), lambda b, nt: (b, nt, 0))]
                 + [_rep_spec(w) for w in w_args],
        out_specs=pl.BlockSpec((1, 1, 1024), lambda b, nt: (b, 0, 0)),
        compiler_params=pltpu.CompilerParams(
            dimension_semantics=("parallel", "arbitrary"),
            vmem_limit_bytes=_vmem_limit_bytes()),
    )(x_pad16, *w_args)
    return out[:, 0, :]                                                 # [B, 1024]


def tnet_head_pallas(g, KP):
    B = g.shape[0]
    w_args = [KP["tf1"], KP["tfb1"], KP["tf2"], KP["tfb2"],
              KP["tf3"], KP["tfb3"], KP["iden"]]
    out = pl.pallas_call(
        _tnet_head_kernel,
        out_shape=jax.ShapeDtypeStruct((B, HEAD_PAD), jnp.float32),
        grid=(1,),
        in_specs=[pl.BlockSpec((B, 1024), lambda i: (0, 0))]
                 + [_rep_spec(w) for w in w_args],
        out_specs=pl.BlockSpec((B, HEAD_PAD), lambda i: (0, 0)),
        compiler_params=pltpu.CompilerParams(
            dimension_semantics=("arbitrary",),
            vmem_limit_bytes=_vmem_limit_bytes()),
    )(g, *w_args)
    return out                                                          # [B, 64]


def pointnet_main_pallas(x_pad16, t_pad16, KP, *, block_n, n_valid):
    B, n_pad, _ = x_pad16.shape
    n_tiles = n_pad // block_n
    w_args = [KP["w1"], KP["b1"], KP["w2"], KP["b2"], KP["w3"], KP["b3"]]
    kernel = functools.partial(_main_trunk_kernel, block_n=block_n, n_valid=n_valid,
                               apply_mask=(n_pad != n_valid))
    out = pl.pallas_call(
        kernel,
        out_shape=jax.ShapeDtypeStruct((B, 1, 1024), jnp.float32),
        grid=(B, n_tiles),
        in_specs=[pl.BlockSpec((1, block_n, CPAD), lambda b, nt: (b, nt, 0)),
                  pl.BlockSpec((1, CPAD, CPAD), lambda b, nt: (b, 0, 0))]
                 + [_rep_spec(w) for w in w_args],
        out_specs=pl.BlockSpec((1, 1, 1024), lambda b, nt: (b, 0, 0)),
        compiler_params=pltpu.CompilerParams(
            dimension_semantics=("parallel", "arbitrary"),
            vmem_limit_bytes=_vmem_limit_bytes()),
    )(x_pad16, t_pad16, *w_args)
    return out[:, 0, :]                                                 # [B, 1024]


def pointnet_feature(x, KP):
    """x: [B, 3, N] (PyTorch NCW).  Returns (global_feat [B,1024], T [B,3,3], None)."""
    B, _, N = x.shape
    block_n = min(NT_MAX, -(-N // 8) * 8)
    n_tiles = -(-N // block_n)
    n_pad = n_tiles * block_n

    x_pts = jnp.transpose(x, (0, 2, 1))                                 # [B, N, 3]
    x_pad = jnp.pad(x_pts, ((0, 0), (0, n_pad - N), (0, CPAD - 3)))     # [B, n_pad, 8]
    x16 = x_pad.astype(jnp.bfloat16)

    # TNet3: bf16 conv trunk streamed over N tiles -> pooled [B, 1024];
    # batched f32 FC head emits the transform already in a padded 8x8 layout.
    g_tnet = tnet_pooled_pallas(x16, KP, block_n=block_n, n_valid=N)    # [B, 1024]
    t_flat = tnet_head_pallas(g_tnet, KP)                               # [B, 64]
    t_pad = t_flat.reshape(B, CPAD, CPAD)                               # zero outside 3x3
    T = t_pad[:, :3, :3]                                                # transformed_matrix

    gfeat = pointnet_main_pallas(x16, t_pad.astype(jnp.bfloat16), KP,
                                 block_n=block_n, n_valid=N)            # [B, 1024]
    # feature_transform=False -> transformed_features is None.
    # TODO(synk): TNet64 / feature_transform=True and the non-global concat branch are
    # not exercised (module defaults: global_feature=True, feature_transform=False).
    # TODO(synk): the point cloud is streamed from HBM twice (TNet trunk + main trunk)
    # because conv1's transform depends on a global max over all points; a single fused
    # kernel would still need two passes over N.
    return gfeat, T, None


# ----------------------------------------------------------------------------
# Deterministic parameter construction (BN folded, eval-mode semantics).
# ----------------------------------------------------------------------------
def make_params(key):
    def lin(k, fan_in, fan_out):
        k1, k2 = jax.random.split(k)
        bound = 1.0 / jnp.sqrt(fan_in)
        w = jax.random.uniform(k1, (fan_in, fan_out), jnp.float32, -bound, bound)
        b = jax.random.uniform(k2, (fan_out,), jnp.float32, -bound, bound)
        return w, b

    def bn(k, c):
        k1, k2, k3, k4 = jax.random.split(k, 4)
        gamma = 1.0 + 0.1 * jax.random.normal(k1, (c,), jnp.float32)
        beta = 0.1 * jax.random.normal(k2, (c,), jnp.float32)
        mean = 0.1 * jax.random.normal(k3, (c,), jnp.float32)
        var = 1.0 + 0.1 * jax.random.uniform(k4, (c,), jnp.float32)
        return gamma, beta, mean, var

    def fold(wb, bnp, eps=1e-5):
        w, b = wb
        gamma, beta, mean, var = bnp
        s = gamma / jnp.sqrt(var + eps)
        return w * s[None, :], ((b - mean) * s + beta)[None, :]

    ks = iter(jax.random.split(key, 32))
    P = {}

    # --- TNet3 conv trunk ---
    w, b = fold(lin(next(ks), 3, 64), bn(next(ks), 64))
    P["tw1"] = jnp.pad(w, ((0, CPAD - 3), (0, 0)));  P["tb1"] = b
    P["tw2"], P["tb2"] = fold(lin(next(ks), 64, 128), bn(next(ks), 128))
    P["tw3"], P["tb3"] = fold(lin(next(ks), 128, 1024), bn(next(ks), 1024))

    # --- TNet3 FC head (fc3 packed into a padded 8x8 = 64-lane layout) ---
    P["tf1"], P["tfb1"] = fold(lin(next(ks), 1024, 512), bn(next(ks), 512))
    P["tf2"], P["tfb2"] = fold(lin(next(ks), 512, 256), bn(next(ks), 256))
    w9, b9 = lin(next(ks), 256, 9)                                   # fc3: no BN
    cols = jnp.array([8 * (k // 3) + (k % 3) for k in range(9)])     # 3x3 -> 8x8 positions
    P["tf3"] = jnp.zeros((256, HEAD_PAD), jnp.float32).at[:, cols].set(w9)
    P["tfb3"] = jnp.zeros((1, HEAD_PAD), jnp.float32).at[0, cols].set(b9)
    P["iden"] = jnp.zeros((1, HEAD_PAD), jnp.float32).at[0, jnp.array([0, 9, 18])].set(1.0)

    # --- main trunk ---
    w, b = fold(lin(next(ks), 3, 64), bn(next(ks), 64))
    P["w1"] = jnp.pad(w, ((0, CPAD - 3), (0, 0)));  P["b1"] = b
    P["w2"], P["b2"] = fold(lin(next(ks), 64, 128), bn(next(ks), 128))
    P["w3"], P["b3"] = fold(lin(next(ks), 128, 1024), bn(next(ks), 1024))
    return P


def prepare_kernel_params(P):
    """bf16 copies of the per-point matmul weights; biases & the FC head stay f32."""
    KP = dict(P)
    for k in ("tw1", "tw2", "tw3", "w1", "w2", "w3"):
        KP[k] = P[k].astype(jnp.bfloat16)
    return KP


# ----------------------------------------------------------------------------
# Pure-JAX f32 reference (mirrors the PyTorch graph with the same folded params).
# ----------------------------------------------------------------------------
def reference_forward(x, P):
    dot = functools.partial(jnp.matmul, precision=jax.lax.Precision.HIGHEST)
    relu = lambda v: jnp.maximum(v, 0.0)
    B, _, N = x.shape
    x_pad = jnp.pad(jnp.transpose(x, (0, 2, 1)), ((0, 0), (0, 0), (0, CPAD - 3)))

    h = relu(dot(x_pad, P["tw1"]) + P["tb1"])
    h = relu(dot(h, P["tw2"]) + P["tb2"])
    h = relu(dot(h, P["tw3"]) + P["tb3"])
    g = jnp.max(h, axis=1)
    g = relu(dot(g, P["tf1"]) + P["tfb1"])
    g = relu(dot(g, P["tf2"]) + P["tfb2"])
    t = dot(g, P["tf3"]) + P["tfb3"] + P["iden"]                      # [B, 64] packed 8x8
    t_pad = t.reshape(B, CPAD, CPAD)
    T = t_pad[:, :3, :3]

    xt = jnp.einsum("bnc,bcd->bnd", x_pad, t_pad, precision=jax.lax.Precision.HIGHEST)
    h = relu(dot(xt, P["w1"]) + P["b1"])
    h = relu(dot(h, P["w2"]) + P["b2"])
    h = dot(h, P["w3"]) + P["b3"]
    return jnp.max(h, axis=1), T


if __name__ == "__main__":
    key = jax.random.PRNGKey(0)
    k_param, k_x = jax.random.split(key)

    B, N = 2, 128                       # small shapes: batch=2, 128 points, 3 coords
    x = jax.random.normal(k_x, (B, 3, N), dtype=jnp.float32)
    P = make_params(k_param)
    KP = prepare_kernel_params(P)

    gfeat, T, feat_T = jax.block_until_ready(pointnet_feature(x, KP))

    g_ref, T_ref = reference_forward(x, P)
    assert gfeat.shape == (B, 1024) and T.shape == (B, 3, 3) and feat_T is None
    # MXU path runs in bf16 with f32 accumulation -> compare at bf16-level tolerance.
    assert jnp.allclose(T, T_ref, rtol=2e-2, atol=2e-2), "transform matrix mismatch"
    assert jnp.allclose(gfeat, g_ref, rtol=2e-2, atol=2e-2), "global feature mismatch"

    print("KERNEL_OK")
</pallas_src>

<mosaic_0001>
module attributes {stable_mosaic.version = 11 : i64} {
  func.func @_tnet_trunk_kernel(%arg0: i32, %arg1: i32, %arg2: memref<1x128x8xbf16, #tpu.memory_space<vmem>>, %arg3: memref<8x64xbf16, #tpu.memory_space<vmem>>, %arg4: memref<1x64xf32, #tpu.memory_space<vmem>>, %arg5: memref<64x128xbf16, #tpu.memory_space<vmem>>, %arg6: memref<1x128xf32, #tpu.memory_space<vmem>>, %arg7: memref<128x1024xbf16, #tpu.memory_space<vmem>>, %arg8: memref<1x1024xf32, #tpu.memory_space<vmem>>, %arg9: memref<1x1x1024xf32, #tpu.memory_space<vmem>>) attributes {dimension_semantics = [#tpu.dimension_semantics<parallel>, #tpu.dimension_semantics<arbitrary>], iteration_bounds = array<i64: 2, 1>, scalar_prefetch = 0 : i64, scratch_operands = 0 : i64, tpu.core_type = #tpu.core_type<tc>, window_params = [{transform_indices = @transform_0, window_bounds = array<i64: 1, 128, 8>}, {pipeline_mode = #tpu.pipeline_mode<synchronous>, transform_indices = @transform_1, window_bounds = array<i64: 8, 64>}, {pipeline_mode = #tpu.pipeline_mode<synchronous>, transform_indices = @transform_2, window_bounds = array<i64: 1, 64>}, {pipeline_mode = #tpu.pipeline_mode<synchronous>, transform_indices = @transform_3, window_bounds = array<i64: 64, 128>}, {pipeline_mode = #tpu.pipeline_mode<synchronous>, transform_indices = @transform_4, window_bounds = array<i64: 1, 128>}, {pipeline_mode = #tpu.pipeline_mode<synchronous>, transform_indices = @transform_5, window_bounds = array<i64: 128, 1024>}, {pipeline_mode = #tpu.pipeline_mode<synchronous>, transform_indices = @transform_6, window_bounds = array<i64: 1, 1024>}, {transform_indices = @transform_7, window_bounds = array<i64: 1, 1, 1024>}]} {
    %c0_i32 = arith.constant 0 : i32
    %0 = arith.cmpi eq, %arg1, %c0_i32 : i32
    %1 = arith.extui %0 : i1 to i32
    %c0_i32_0 = arith.constant 0 : i32
    %2 = arith.cmpi ne, %1, %c0_i32_0 : i32
    scf.if %2 {
      %cst_27 = arith.constant 0xFF800000 : f32
      %36 = vector.broadcast %cst_27 : f32 to vector<1x1024xf32>
      %c0_28 = arith.constant 0 : index
      %c0_29 = arith.constant 0 : index
      %c0_30 = arith.constant 0 : index
      %37 = vector.load %arg9[%c0_28, %c0_29, %c0_30] : memref<1x1x1024xf32, #tpu.memory_space<vmem>>, vector<1x1x1024xf32>
      %38 = vector.shape_cast %37 : vector<1x1x1024xf32> to vector<1x1024xf32>
      %39 = vector.shape_cast %36 : vector<1x1024xf32> to vector<1x1x1024xf32>
      tpu.vector_store %arg9[%c0_28, %c0_29, %c0_30], %39 {strides = array<i32>} : memref<1x1x1024xf32, #tpu.memory_space<vmem>>, vector<1x1x1024xf32>,
    } else {
    }
    %c0 = arith.constant 0 : index
    %c0_1 = arith.constant 0 : index
    %c0_2 = arith.constant 0 : index
    %3 = vector.load %arg2[%c0, %c0_1, %c0_2] : memref<1x128x8xbf16, #tpu.memory_space<vmem>>, vector<1x128x8xbf16>
    %4 = vector.shape_cast %3 : vector<1x128x8xbf16> to vector<128x8xbf16>
    %c0_3 = arith.constant 0 : index
    %c0_4 = arith.constant 0 : index
    %5 = vector.load %arg3[%c0_3, %c0_4] : memref<8x64xbf16, #tpu.memory_space<vmem>>, vector<8x64xbf16>
    %cst = arith.constant dense<0.000000e+00> : vector<128x64xf32>
    %6 = tpu.matmul %4, %5, %cst {dimension_numbers = #tpu.dot_dimension_numbers<[1], [0], [0], [1], [0, 0, 1, 1], [], []>} : vector<128x8xbf16>, vector<8x64xbf16>, vector<128x64xf32> -> vector<128x64xf32>
    %c0_5 = arith.constant 0 : index
    %c0_6 = arith.constant 0 : index
    %7 = vector.load %arg4[%c0_5, %c0_6] : memref<1x64xf32, #tpu.memory_space<vmem>>, vector<1x64xf32>
    %8 = vector.broadcast %7 : vector<1x64xf32> to vector<128x64xf32>
    %9 = arith.addf %6, %8 : vector<128x64xf32>
    %cst_7 = arith.constant 0.000000e+00 : f32
    %10 = vector.broadcast %cst_7 : f32 to vector<128x64xf32>
    %11 = arith.maximumf %9, %10 : vector<128x64xf32>
    %12 = arith.truncf %11 : vector<128x64xf32> to vector<128x64xbf16>
    %c0_8 = arith.constant 0 : index
    %c0_9 = arith.constant 0 : index
    %13 = vector.load %arg5[%c0_8, %c0_9] : memref<64x128xbf16, #tpu.memory_space<vmem>>, vector<64x128xbf16>
    %cst_10 = arith.constant dense<0.000000e+00> : vector<128x128xf32>
    %14 = tpu.matmul %12, %13, %cst_10 {dimension_numbers = #tpu.dot_dimension_numbers<[1], [0], [0], [1], [0, 0, 1, 1], [], []>} : vector<128x64xbf16>, vector<64x128xbf16>, vector<128x128xf32> -> vector<128x128xf32>
    %c0_11 = arith.constant 0 : index
    %c0_12 = arith.constant 0 : index
    %15 = vector.load %arg6[%c0_11, %c0_12] : memref<1x128xf32, #tpu.memory_space<vmem>>, vector<1x128xf32>
    %16 = vector.broadcast %15 : vector<1x128xf32> to vector<128x128xf32>
    %17 = arith.addf %14, %16 : vector<128x128xf32>
    %cst_13 = arith.constant 0.000000e+00 : f32
    %18 = vector.broadcast %cst_13 : f32 to vector<128x128xf32>
    %19 = arith.maximumf %17, %18 : vector<128x128xf32>
    %20 = arith.truncf %19 : vector<128x128xf32> to vector<128x128xbf16>
    %c0_14 = arith.constant 0 : index
    %c0_15 = arith.constant 0 : index
    %21 = vector.load %arg7[%c0_14, %c0_15] : memref<128x1024xbf16, #tpu.memory_space<vmem>>, vector<128x1024xbf16>
    %cst_16 = arith.constant dense<0.000000e+00> : vector<128x1024xf32>
    %22 = tpu.matmul %20, %21, %cst_16 {dimension_numbers = #tpu.dot_dimension_numbers<[1], [0], [0], [1], [0, 0, 1, 1], [], []>} : vector<128x128xbf16>, vector<128x1024xbf16>, vector<128x1024xf32> -> vector<128x1024xf32>
    %c0_17 = arith.constant 0 : index
    %c0_18 = arith.constant 0 : index
    %23 = vector.load %arg8[%c0_17, %c0_18] : memref<1x1024xf32, #tpu.memory_space<vmem>>, vector<1x1024xf32>
    %24 = vector.broadcast %23 : vector<1x1024xf32> to vector<128x1024xf32>
    %25 = arith.addf %22, %24 : vector<128x1024xf32>
    %cst_19 = arith.constant 0.000000e+00 : f32
    %26 = vector.broadcast %cst_19 : f32 to vector<128x1024xf32>
    %27 = arith.maximumf %25, %26 : vector<128x1024xf32>
    %c0_20 = arith.constant 0 : index
    %c0_21 = arith.constant 0 : index
    %c0_22 = arith.constant 0 : index
    %28 = vector.load %arg9[%c0_20, %c0_21, %c0_22] : memref<1x1x1024xf32, #tpu.memory_space<vmem>>, vector<1x1x1024xf32>
    %29 = vector.shape_cast %28 : vector<1x1x1024xf32> to vector<1x1024xf32>
    %cst_23 = arith.constant dense<0xFF800000> : vector<1024xf32>
    %30 = vector.multi_reduction <maximumf>, %27, %cst_23 [0] : vector<128x1024xf32> to vector<1024xf32>
    %31 = vector.shape_cast %30 : vector<1024xf32> to vector<1x1024xf32>
    %32 = arith.maximumf %29, %31 : vector<1x1024xf32>
    %c0_24 = arith.constant 0 : index
    %c0_25 = arith.constant 0 : index
    %c0_26 = arith.constant 0 : index
    %33 = vector.load %arg9[%c0_24, %c0_25, %c0_26] : memref<1x1x1024xf32, #tpu.memory_space<vmem>>, vector<1x1x1024xf32>
    %34 = vector.shape_cast %33 : vector<1x1x1024xf32> to vector<1x1024xf32>
    %35 = vector.shape_cast %32 : vector<1x1024xf32> to vector<1x1x1024xf32>
    tpu.vector_store %arg9[%c0_24, %c0_25, %c0_26], %35 {strides = array<i32>} : memref<1x1x1024xf32, #tpu.memory_space<vmem>>, vector<1x1x1024xf32>,
    return
  }
  func.func @transform_0(%arg0: i32, %arg1: i32) -> (i32, i32, i32) {
    %c0_i32 = arith.constant 0 : i32
    %c0_i32_0 = arith.constant 0 : i32
    return %arg0, %arg1, %c0_i32 : i32, i32, i32
  }
  func.func @transform_1(%arg0: i32, %arg1: i32) -> (i32, i32) {
    %c0_i32 = arith.constant 0 : i32
    %c0_i32_0 = arith.constant 0 : i32
    %c0_i32_1 = arith.constant 0 : i32
    return %c0_i32, %c0_i32_0 : i32, i32
  }
  func.func @transform_2(%arg0: i32, %arg1: i32) -> (i32, i32) {
    %c0_i32 = arith.constant 0 : i32
    %c0_i32_0 = arith.constant 0 : i32
    %c0_i32_1 = arith.constant 0 : i32
    return %c0_i32, %c0_i32_0 : i32, i32
  }
  func.func @transform_3(%arg0: i32, %arg1: i32) -> (i32, i32) {
    %c0_i32 = arith.constant 0 : i32
    %c0_i32_0 = arith.constant 0 : i32
    %c0_i32_1 = arith.constant 0 : i32
    return %c0_i32, %c0_i32_0 : i32, i32
  }
  func.func @transform_4(%arg0: i32, %arg1: i32) -> (i32, i32) {
    %c0_i32 = arith.constant 0 : i32
    %c0_i32_0 = arith.constant 0 : i32
    %c0_i32_1 = arith.constant 0 : i32
    return %c0_i32, %c0_i32_0 : i32, i32
  }
  func.func @transform_5(%arg0: i32, %arg1: i32) -> (i32, i32) {
    %c0_i32 = arith.constant 0 : i32
    %c0_i32_0 = arith.constant 0 : i32
    %c0_i32_1 = arith.constant 0 : i32
    return %c0_i32, %c0_i32_0 : i32, i32
  }
  func.func @transform_6(%arg0: i32, %arg1: i32) -> (i32, i32) {
    %c0_i32 = arith.constant 0 : i32
    %c0_i32_0 = arith.constant 0 : i32
    %c0_i32_1 = arith.constant 0 : i32
    return %c0_i32, %c0_i32_0 : i32, i32
  }
  func.func @transform_7(%arg0: i32, %arg1: i32) -> (i32, i32, i32) {
    %c0_i32 = arith.constant 0 : i32
    %c0_i32_0 = arith.constant 0 : i32
    %c0_i32_1 = arith.constant 0 : i32
    return %arg0, %c0_i32, %c0_i32_0 : i32, i32, i32
  }
}

</mosaic_0001>

<bundles_post_ra>
// kernel: tpu_custom_call.1
= control target key start
LH: loop header
LB: loop body
LE: loop exit
PB: predicated region body
PF: predicated region fallthrough
CT: control target
= control target key end

     0   :  { %12 = vsyncpa [#allocation3], 0  ;;  %s2969_s0 = inlined_call_operand.vmem [shape: bf16[2,128,8], index: 0, kind: input, shape index: {}]   ;;  %s2970_s1 = inlined_call_operand.vmem [shape: bf16[8,64], index: 1, kind: input, shape index: {}]   ;;  %s2971_s2 = inlined_call_operand.vmem [shape: f32[1,64], index: 2, kind: input, shape index: {}]   ;;  %s2972_s3 = inlined_call_operand.vmem [shape: bf16[64,128], index: 3, kind: input, shape index: {}]   ;;  %s2973_s4 = inlined_call_operand.vmem [shape: f32[1,128], index: 4, kind: input, shape index: {}]   ;;  %s2974_s5 = inlined_call_operand.hbm [shape: bf16[128,1024], index: 5, kind: input, shape index: {}]   ;;  %s2975_s6 = inlined_call_operand.vmem [shape: f32[1,1024], index: 6, kind: input, shape index: {}]   ;;  %s2976_s7 = inlined_call_operand.hbm [shape: f32[2,1,1024], index: 7, kind: output, shape index: {}]  }
   0x1   :  { %13 = vsyncpa [#allocation4], 0 }
   0x2   :  { %15 = vsyncpa [#allocation4 + $0x1], 0  ;;  %s2500_s24 = smov 0   ;;  %s2502_s25 = smov 0  }
   0x3   :  { %s2504_s26 = smov 0   ;;  %s2506_s27 = smov 0  }
   0x4   :  { %s2508_s28 = smov 0   ;;  %s2510_s29 = smov 0  }
   0x5 LB: > { %s1848_s30 = sadd.s32 4294967295, %s2455_s29   ;;  %s1849_s8 = sadd.s32 4294967294, %s2455_s29   ;;  %s2455_s29 = sphi %s2510_s29, %s21_s29   ;;  %s2451_s28 = sphi %s2508_s28, %s2983_s28   ;;  %s2447_s27 = sphi %s2506_s27, %s2982_s27   ;;  %s2443_s26 = sphi %s2504_s26, %s2981_s26   ;;  %s2439_s25 = sphi %s2502_s25, %s2980_s25   ;;  %s2435_s24 = sphi %s2500_s24, %s2979_s24  }
   0x6   : > { %s33_s9 = sadd.s32 1, %s2451_s28  ;;  %s194_s10 = sadd.s32 1, %s2443_s26 }
   0x7   : > { %p35_p0 = scmp.ge.s32.totalorder %s33_s9, 2  ;;  %p204_p1 = scmp.ne.s32.totalorder %s2443_s26, %s2439_s25 }
   0x8   : > { %p205_p2 = scmp.eq.s32.totalorder %s1848_s30, 1  ;;  %p210_p3 = scmp.ne.s32.totalorder %s2439_s25, %s2435_s24 }
   0x9   : > { %s2985_s9 = smov (%p35_p0, %s33_s9), 0  ;;  %p211_p5 = scmp.eq.s32.totalorder %s1849_s8, 1 }
   0xa   : > { %p2540_p4 = por %p205_p2, %p204_p1  ;;  %s191_s12 = ssub.s32 %s2451_s28, %s2985_s9 }
   0xb   : > { %p1850_p6 = scmp.ge.s32.totalorder %s2455_s29, 1  ;;  %p192_p7 = scmp.eq.s32.totalorder %s191_s12, 0 }
   0xc   : > { %p2547_p8 = por %p211_p5, %p210_p3  ;;  %p218_p9 = scmp.lt.s32.totalorder %s2455_s29, 3 }
   0xd   : > { %s2553_s14 = scalar_select %p192_p7, %s2443_s26, %s194_s10  }
   0xe   : > { %p219_p10 = pnand %p1850_p6, %p218_p9  ;;  %p2286_p11 = scmp.eq.s32.totalorder %s1848_s30, 0 }
   0xf   : > { %s241_s17 = sshll.u32 %s2974_s5, 4  ;;  %s2457_s18 = smov [#allocation2]   ;;  %s242_s17 = int_to_ptr.hbm [resolvable:$true] %s241_s17 }
  0x10   : > { %p2278_p12 = pneg %p219_p10  ;;  %s243_s19 = sshll.u32 %s2457_s18, 4  ;;  %s244_s19 = int_to_ptr.vmem [resolvable:$true] %s243_s19 }
  0x11   : > { %s2458_s20 = smov 512   ;;  %s2459_s21 = smov 32  }
  0x12   : > { %p2279_p13 = pnand %p2286_p11, %p2278_p12  ;;  %275 = sbr.rel (%p219_p10) target bundleno = 733 (0x2dd), region = 48 }
  0x14   : > { %2281 = dma.hbm_to_vmem [thread:$0]  (!%p2279_p13), %s242_s17, 8192, %s244_s19, [#allocation3], %s2458_s20, %s2458_s20, %s2459_s21  }
  0x17   : > { %2426 = dma.done.wait (%p2286_p11), [#allocation3], 8192  }
  0x18   : > { %2428 = vsyncadd (%p2286_p11), [#allocation3], 4294959104  ;;  %p313_p0 = scmp.lt.s32.totalorder %s2447_s27, 1  ;;  %vm414_vm0 = vcmask 1043456   ;;  %v344_v0 = vld [vmem:[%s2970_s1] sm:$0xf] }
  0x19   : > { %v416_v1 = vsel %vm414_vm0, %v344_v0, 0  ;;  %vm389_vm1 = vcmask 64512   ;;  %v2194_v10 = vld [vmem:[%s2972_s3 + $0x18] sm:$0xff]  ;;  %v2193_v11 = vld [vmem:[%s2972_s3 + $0x10] sm:$0xff]  ;;  %v2192_v12 = vld [vmem:[%s2972_s3 + $0x8] sm:$0xff]  ;;  %vm527_vm2 = vcmask 523264  }
  0x1a   : > { %s314_s22 = scalar_select %p313_p0, %s2447_s27, 1  ;;  %425 = vmatpush.bf16.msra.mxu0 %v416_v1  ;;  %2259 = vmatpush.bf16.msra.mxu3 %v416_v1  ;;  %v2191_v13 = vld [vmem:[%s2972_s3] sm:$0xff]  ;;  %v2156_v45 = vld [vmem:[#allocation2 + $0x1c8] sm:$0xf]  ;;  %v2252_v54 = vld [vmem:[#allocation2 + $0x1cc] sm:$0xf] }
  0x1b   : > { %556 = vmatpush.bf16.msra.mxu1 %v2194_v10  ;;  %2260 = vmatpush.bf16.msra.mxu2 %v2194_v10  ;;  %v2590_v15 = vld [vmem:[%s2971_s2] ss:$0 sm:$0xff]  ;;  %v2256_v46 = vld [vmem:[#allocation2 + $0x1e4] sm:$0xf0]  ;;  %v2251_v47 = vld [vmem:[#allocation2 + $0x1c4] sm:$0xf] }
  0x1c   : > { %s2182_s23 = sshll.u32 %s314_s22, 6  ;;  %v2157_v49 = vor.u32 %v2256_v46, %v2156_v45  ;;  %v2150_v50 = vld [vmem:[#allocation2 + $0x1e0] sm:$0xf0]  ;;  %v2124_v51 = vld [vmem:[#allocation2 + $0x188] sm:$0xf]  ;;  %vm1733_vm3 = vcmask 1042434  }
  0x1d   : > { %s320_s10 = scalar_lea.vmem %s2969_s0, %s2182_s23  ;;  %v2248_v52 = vld [vmem:[#allocation2 + $0x1a4] sm:$0xf0]  ;;  %v2153_v53 = vor.u32 %v2251_v47, %v2150_v50  ;;  %v2158_v55 = vld [vmem:[#allocation2 + $0x1e8] sm:$0xf0]  ;;  %v2243_v56 = vld [vmem:[#allocation2 + $0x184] sm:$0xf] }
  0x1e   : > { %v2183_v2 = vld [vmem:[%s320_s10] sm:$0xff]  ;;  %v2184_v3 = vld [vmem:[%s320_s10 + $0x8] sm:$0xff]  ;;  %v2185_v5 = vld [vmem:[%s320_s10 + $0x10] sm:$0xff]  ;;  %1125 = vmatpush.bf16.msrb.mxu0 %v2157_v49  ;;  %v2125_v59 = vor.u32 %v2248_v52, %v2124_v51  ;;  %v2161_v60 = vor.u32 %v2252_v54, %v2158_v55  ;;  %vm1731_vm4 = vcmask 1040384   ;;  %vm1735_vm5 = vcmask 1041408   ;;  %s309_s17 = sand.u32 1, %s2439_s25  }
  0x1f   : > { %1890 = vmatmul.msk.bf16.vlgmr.msra.gmra.mxu0 %vm389_vm1, %v2183_v2  ;;  %v2188_v4 = vld [vmem:[%s320_s10 + $0x28] sm:$0xff]  ;;  %v2189_v6 = vld [vmem:[%s320_s10 + $0x30] sm:$0xff]  ;;  %v2186_v7 = vld [vmem:[%s320_s10 + $0x18] sm:$0xff]  ;;  %557 = vmatpush.bf16.msra.mxu1 %v2193_v11  ;;  %vm1737_vm6 = vcmask 1044484   ;;  %s1855_s18 = sshll.u32 %s309_s17, 3  ;;  %s2179_s19 = sshll.u32 %s2447_s27, 3 }
  0x20   : > { %1895 = vmatmul.msk.bf16.vlgmr.msra.gmra.mxu3 %vm389_vm1, %v2188_v4  ;;  %v2190_v8 = vld [vmem:[%s320_s10 + $0x38] sm:$0xff]  ;;  %v2187_v9 = vld [vmem:[%s320_s10 + $0x20] sm:$0xff]  ;;  %2261 = vmatpush.bf16.msra.mxu2 %v2193_v11  ;;  %v2092_v62 = vld [vmem:[#allocation2 + $0x148] sm:$0xf]  ;;  %vm1739_vm7 = vcmask 1046534   ;;  %s1758_s22 = scalar_lea.hbm %s2976_s7, %s2179_s19  ;;  %vm1741_vm8 = vcmask 1045508  }
  0x21   : > { %v2118_v61 = vld [vmem:[#allocation2 + $0x1a0] sm:$0xf0]  ;;  %1076 = vmatpush.bf16.msrb.mxu3 %v2153_v53  ;;  %v2240_v1 = vld [vmem:[#allocation2 + $0x164] sm:$0xf0]  ;;  %v2244_v4 = vld [vmem:[#allocation2 + $0x18c] sm:$0xf] }
  0x22   : > { %v2121_v0 = vor.u32 %v2243_v56, %v2118_v61  ;;  %v2235_v2 = vld [vmem:[#allocation2 + $0x144] sm:$0xf]  ;;  %1126 = vmatpush.bf16.msrb.mxu0 %v2125_v59  ;;  %v2093_v10 = vor.u32 %v2240_v1, %v2092_v62  ;;  %v2231_v45 = vld [vmem:[#allocation2 + $0x11c] sm:$0xf0]  ;;  %s311_s23 = scalar_lea.vmem [#allocation5], %s1855_s18  ;;  %s1762_s8 = sshll.u32 %s1758_s22, 4  ;;  %s1763_s8 = int_to_ptr.hbm [resolvable:$true] %s1762_s8 }
  0x23   : > { %558 = vmatpush.bf16.msra.mxu1 %v2192_v12  ;;  %v2211_v51 = vld [vmem:[#allocation2 + $0x84] sm:$0xf]  ;;  %v2020_v1 = vld [vmem:[#allocation2 + $0xc0] sm:$0xf]  ;;  %s1760_s30 = sshll.u32 %s311_s23, 4  ;;  %s1748_s27 = scalar_lea.sflag [#allocation4], %s309_s17  ;;  %s1761_s30 = int_to_ptr.vmem [resolvable:$true] %s1760_s30 }
  0x24   : > { %2262 = vmatpush.bf16.msra.mxu2 %v2192_v12  ;;  %v2060_v12 = vld [vmem:[#allocation2 + $0x108] sm:$0xf]  ;;  %v1990_v52 = vld [vmem:[#allocation2 + $0xa0] sm:$0xf0]  ;;  %s2387_s10 = sshra.s32 %s1763_s8, 4  ;;  %s2393_s18 = scalar_lea.hbm %s2976_s7, 16  ;;  %s2388_s10 = int_to_ptr.hbm [resolvable:$true] %s2387_s10 }
  0x25   : > { %1077 = vmatpush.bf16.msrb.mxu3 %v2121_v0  ;;  %v1993_v56 = vor.u32 %v2211_v51, %v1990_v52  ;;  %v2172_v51 = vld [vmem:[#allocation2 + $0x1d8] sm:$0xf]  ;;  %s2389_s12 = scalar_lea.hbm %s2388_s10, 8  ;;  %p2394_p5 = scmp.lt.s32.totalorder %s2388_s10, %s2976_s7 }
  0x26   : > { %1127 = vmatpush.bf16.msrb.mxu0 %v2093_v10  ;;  %v2258_v52 = vld [vmem:[#allocation2 + $0x1f4] sm:$0xf0]  ;;  %p2390_p1 = scmp.ne.s32.totalorder %s2388_s10, %s2389_s12  ;;  %p2395_p6 = scmp.lt.s32.totalorder %s2393_s18, %s2389_s12 }
  0x27   : > { %559 = vmatpush.bf16.msra.mxu1 %v2191_v13 }
  0x28   : > { %2263 = vmatpush.bf16.msra.mxu2 %v2191_v13  ;;  %v2232_v13 = vld [vmem:[#allocation2 + $0x124] sm:$0xf0]  ;;  %p2391_p2 = pnand %p2390_p1, %p2540_p4  ;;  %p2396_p7 = por %p2395_p6, %p2394_p5 }
  0x2a   : > { %p2392_p3 = pneg %p2391_p2 }
  0x2b   : > { %1174 = vmatpush.bf16.msrb.mxu1 %v2161_v60 }
  0x2c   : > { %p2397_p9 = pnand %p2396_p7, %p2392_p3 }
  0x2f   : > { %1891 = vmatmul.msk.bf16.gmra.mxu0 %vm389_vm1, %v2184_v3  ;;  %v2086_v3 = vld [vmem:[#allocation2 + $0x160] sm:$0xf0] }
  0x30   : > { %1896 = vmatmul.msk.bf16.gmra.mxu3 %vm389_vm1, %v2189_v6  ;;  %v2148_v6 = vld [vmem:[#allocation2 + $0x1c0] sm:$0xf] }
  0x3f   : > { %1892 = vmatmul.msk.bf16.gmra.mxu0 %vm389_vm1, %v2185_v5  ;;  %v2126_v5 = vld [vmem:[#allocation2 + $0x1a8] sm:$0xf0] }
  0x40   : > { %1897 = vmatmul.msk.bf16.gmra.mxu3 %vm389_vm1, %v2190_v8  ;;  %v2129_v8 = vor.u32 %v2244_v4, %v2126_v5  ;;  %v2030_v5 = vld [vmem:[#allocation2 + $0xe8] sm:$0xf0] }
  0x42   : > { %1175 = vmatpush.bf16.msrb.mxu1 %v2129_v8  ;;  %v2215_v8 = vld [vmem:[#allocation2 + $0x9c] sm:$0xf0] }
  0x4f   : > { %1893 = vmatmul.msk.bf16.gmra.mxu0 %vm389_vm1, %v2186_v7 }
  0x5f   : > { %1894 = vmatmul.msk.bf16.gmra.mxu0 %vm389_vm1, %v2187_v9  ;;  %v2255_v9 = vld [vmem:[#allocation2 + $0x1dc] sm:$0xf0] }
  0x60   : > { %v2149_v11 = vor.u32 %v2255_v9, %v2148_v6  ;;  %v1996_v9 = vld [vmem:[#allocation2 + $0x88] sm:$0xf] }
  0x62   : > { %1027 = vmatpush.bf16.msrb.mxu2 %v2149_v11  ;;  %v2212_v11 = vld [vmem:[#allocation2 + $0x8c] sm:$0xf] }
  0x9c   : > { %v427_v14 = vpop.f32.mrf.mxu0 }
  0x9d   : > { %v428_v16 = vadd.f32 %v2590_v15, %v427_v14 }
  0x9f   : > { %v467_v19 = vmax.f32 %v428_v16, 0.0 }
  0xa3   : > { %v452_v26 = vpop.f32.mrf.mxu3 }
  0xa4   : > { %v429_v17 = vpop.f32.mrf.mxu0  ;;  %v453_v30 = vadd.f32 %v2590_v15, %v452_v26 }
  0xa5   : > { %v430_v18 = vadd.f32 %v2590_v15, %v429_v17  ;;  %v2089_v17 = vor.u32 %v2235_v2, %v2086_v3  ;;  %v2223_v2 = vld [vmem:[#allocation2 + $0xdc] sm:$0xf0]  ;;  %v2220_v3 = vld [vmem:[#allocation2 + $0xcc] sm:$0xf] }
  0xa6   : > { %v477_v33 = vmax.f32 %v453_v30, 0.0  ;;  %v2021_v4 = vor.u32 %v2223_v2, %v2020_v1  ;;  %v2033_v6 = vor.u32 %v2220_v3, %v2030_v5  ;;  %v2102_v1 = vld [vmem:[#allocation2 + $0x170] sm:$0xf0]  ;;  %v2254_v3 = vld [vmem:[#allocation2 + $0x1dc] sm:$0xf] }
  0xa7   : > { %v468_v20 = vmax.f32 %v430_v18, 0.0  ;;  %v2116_v18 = vld [vmem:[#allocation2 + $0x180] sm:$0xf]  ;;  %1078 = vmatpush.bf16.msrb.mxu3 %v2089_v17 }
  0xa9   : > { %v483_v21 = vpack.c.bf16 %v468_v20, %v467_v19  ;;  %v2247_v19 = vld [vmem:[#allocation2 + $0x19c] sm:$0xf0]  ;;  %v2236_v20 = vld [vmem:[#allocation2 + $0x14c] sm:$0xf] }
  0xab   : > { %1914 = vmatmul.msk.bf16.vlgmr.msra.gmra.mxu1 %vm527_vm2, %v483_v21  ;;  %v454_v32 = vpop.f32.mrf.mxu3 }
  0xac   : > { %v432_v22 = vpop.f32.mrf.mxu0  ;;  %v455_v34 = vadd.f32 %v2590_v15, %v454_v32  ;;  %v2228_v32 = vld [vmem:[#allocation2 + $0x10c] sm:$0xf] }
  0xad   : > { %v433_v23 = vadd.f32 %v2590_v15, %v432_v22  ;;  %v2227_v22 = vld [vmem:[#allocation2 + $0x104] sm:$0xf] }
  0xae   : > { %v478_v35 = vmax.f32 %v455_v34, 0.0 }
  0xaf   : > { %v469_v27 = vmax.f32 %v433_v23, 0.0  ;;  %v2054_v23 = vld [vmem:[#allocation2 + $0x120] sm:$0xf0] }
  0xb0   : > { %v488_v37 = vpack.c.bf16 %v478_v35, %v477_v33  ;;  %v2062_v33 = vld [vmem:[#allocation2 + $0x128] sm:$0xf0] }
  0xb2   : > { %1919 = vmatmul.msk.bf16.vlgmr.msra.gmra.mxu2 %vm527_vm2, %v488_v37  ;;  %v2219_v37 = vld [vmem:[#allocation2 + $0xc4] sm:$0xf] }
  0xb3   : > { %v457_v40 = vpop.f32.mrf.mxu3 }
  0xb4   : > { %v434_v24 = vpop.f32.mrf.mxu0  ;;  %v458_v44 = vadd.f32 %v2590_v15, %v457_v40  ;;  %v2065_v40 = vor.u32 %v2228_v32, %v2062_v33  ;;  %v2199_v32 = vld [vmem:[#allocation2 + $0x1c] sm:$0xf0]  ;;  %v1932_v33 = vld [vmem:[#allocation2 + $0x8] sm:$0xf] }
  0xb5   : > { %v435_v25 = vadd.f32 %v2590_v15, %v434_v24  ;;  %v2117_v24 = vor.u32 %v2247_v19, %v2116_v18  ;;  %v1956_v19 = vld [vmem:[#allocation2 + $0x40] sm:$0xf] }
  0xb6   : > { %v479_v57 = vmax.f32 %v458_v44, 0.0  ;;  %v2052_v44 = vld [vmem:[#allocation2 + $0x100] sm:$0xf] }
  0xb7   : > { %v470_v28 = vmax.f32 %v435_v25, 0.0  ;;  %v2094_v25 = vld [vmem:[#allocation2 + $0x168] sm:$0xf0]  ;;  %1028 = vmatpush.bf16.msrb.mxu2 %v2117_v24  ;;  %v2053_v50 = vor.u32 %v2231_v45, %v2052_v44  ;;  %v2164_v44 = vld [vmem:[#allocation2 + $0x1d0] sm:$0xf] }
  0xb8   : > { %v2204_v24 = vld [vmem:[#allocation2 + $0x4c] sm:$0xf]  ;;  %v2257_v45 = vld [vmem:[#allocation2 + $0x1ec] sm:$0xf0] }
  0xb9   : > { %v484_v29 = vpack.c.bf16 %v470_v28, %v469_v27  ;;  %v2097_v27 = vor.u32 %v2236_v20, %v2094_v25  ;;  %v2084_v28 = vld [vmem:[#allocation2 + $0x140] sm:$0xf]  ;;  %v1966_v25 = vld [vmem:[#allocation2 + $0x68] sm:$0xf0] }
  0xba   : > { %v2207_v20 = vld [vmem:[#allocation2 + $0x5c] sm:$0xf0] }
  0xbb   : > { %1915 = vmatmul.msk.bf16.gmra.mxu1 %vm527_vm2, %v484_v29  ;;  %v459_v58 = vpop.f32.mrf.mxu3  ;;  %v2239_v29 = vld [vmem:[#allocation2 + $0x15c] sm:$0xf0] }
  0xbc   : > { %v437_v31 = vpop.f32.mrf.mxu0  ;;  %v460_v63 = vadd.f32 %v2590_v15, %v459_v58  ;;  %1176 = vmatpush.bf16.msrb.mxu1 %v2097_v27  ;;  %v1969_v27 = vor.u32 %v2204_v24, %v1966_v25  ;;  %v2108_v25 = vld [vmem:[#allocation2 + $0x158] sm:$0xf] }
  0xbd   : > { %v438_v36 = vadd.f32 %v2590_v15, %v437_v31  ;;  %v2061_v31 = vor.u32 %v2232_v13, %v2060_v12  ;;  %v1998_v12 = vld [vmem:[#allocation2 + $0xa8] sm:$0xf0]  ;;  %v2203_v13 = vld [vmem:[#allocation2 + $0x44] sm:$0xf] }
  0xbe   : > { %v480_v7 = vmax.f32 %v460_v63, 0.0  ;;  %v2001_v17 = vor.u32 %v2212_v11, %v1998_v12 }
  0xbf   : > { %v471_v41 = vmax.f32 %v438_v36, 0.0  ;;  %v2057_v36 = vor.u32 %v2227_v22, %v2054_v23  ;;  %1128 = vmatpush.bf16.msrb.mxu0 %v2061_v31  ;;  %v1957_v22 = vor.u32 %v2207_v20, %v1956_v19  ;;  %v2208_v23 = vld [vmem:[#allocation2 + $0x64] sm:$0xf0]  ;;  %v2070_v20 = vld [vmem:[#allocation2 + $0x130] sm:$0xf0] }
  0xc0   : > { %v489_v16 = vpack.c.bf16 %v480_v7, %v479_v57  ;;  %1177 = vmatpush.bf16.msrb.mxu1 %v2065_v40  ;;  %v1988_v7 = vld [vmem:[#allocation2 + $0x80] sm:$0xf]  ;;  %v2253_v40 = vld [vmem:[#allocation2 + $0x1d4] sm:$0xf] }
  0xc1   : > { %1079 = vmatpush.bf16.msrb.mxu3 %v2057_v36  ;;  %v1989_v10 = vor.u32 %v2215_v8, %v1988_v7  ;;  %v2250_v7 = vld [vmem:[#allocation2 + $0x1b4] sm:$0xf0] }
  0xc2   : > { %1920 = vmatmul.msk.bf16.gmra.mxu2 %vm527_vm2, %v489_v16 }
  0xc3   : > { %v462_v30 = vpop.f32.mrf.mxu3 }
  0xc4   : > { %v439_v38 = vpop.f32.mrf.mxu0  ;;  %v463_v47 = vadd.f32 %v2590_v15, %v462_v30  ;;  %1178 = vmatpush.bf16.msrb.mxu1 %v2033_v6  ;;  %v1924_v30 = vld [vmem:[#allocation2] sm:$0xf]  ;;  %v2140_v6 = vld [vmem:[#allocation2 + $0x198] sm:$0xf] }
  0xc5   : > { %v440_v39 = vadd.f32 %v2590_v15, %v439_v38  ;;  %v2022_v38 = vld [vmem:[#allocation2 + $0xe0] sm:$0xf0]  ;;  %v2141_v8 = vor.u32 %v2250_v7, %v2140_v6 }
  0xc6   : > { %v481_v54 = vmax.f32 %v463_v47, 0.0  ;;  %v2165_v47 = vor.u32 %v2257_v45, %v2164_v44  ;;  %v2076_v44 = vld [vmem:[#allocation2 + $0x118] sm:$0xf] }
  0xc7   : > { %v472_v42 = vmax.f32 %v440_v39, 0.0  ;;  %v2085_v39 = vor.u32 %v2239_v29, %v2084_v28  ;;  %v2195_v28 = vld [vmem:[#allocation2 + $0x4] sm:$0xf]  ;;  %v2234_v45 = vld [vmem:[#allocation2 + $0x134] sm:$0xf0] }
  0xc8   : > { %1179 = vmatpush.bf16.msrb.mxu1 %v2001_v17  ;;  %v1926_v29 = vld [vmem:[#allocation2 + $0x20] sm:$0xf0]  ;;  %v2241_v17 = vld [vmem:[#allocation2 + $0x16c] sm:$0xf0] }
  0xc9   : > { %v485_v43 = vpack.c.bf16 %v472_v42, %v471_v41  ;;  %v2028_v41 = vld [vmem:[#allocation2 + $0xc8] sm:$0xf]  ;;  %1029 = vmatpush.bf16.msrb.mxu2 %v2085_v39  ;;  %v1929_v31 = vor.u32 %v2195_v28, %v1926_v29 }
  0xca   : > { %v2224_v42 = vld [vmem:[#allocation2 + $0xe4] sm:$0xf0] }
  0xcb   : > { %1916 = vmatmul.msk.bf16.gmra.mxu1 %vm527_vm2, %v485_v43  ;;  %v2029_v46 = vor.u32 %v2224_v42, %v2028_v41  ;;  %v464_v53 = vpop.f32.mrf.mxu3  ;;  %v2166_v41 = vld [vmem:[#allocation2 + $0x1f0] sm:$0xf0] }
  0xcc   : > { %v442_v48 = vpop.f32.mrf.mxu0  ;;  %v465_v55 = vadd.f32 %v2590_v15, %v464_v53  ;;  %1180 = vmatpush.bf16.msrb.mxu1 %v1969_v27  ;;  %v2169_v42 = vor.u32 %v2253_v40, %v2166_v41  ;;  %v2173_v53 = vor.u32 %v2258_v52, %v2172_v51  ;;  %v2238_v40 = vld [vmem:[#allocation2 + $0x15c] sm:$0xf] }
  0xcd   : > { %v443_v14 = vadd.f32 %v2590_v15, %v442_v48  ;;  %v2025_v48 = vor.u32 %v2219_v37, %v2022_v38  ;;  %1129 = vmatpush.bf16.msrb.mxu0 %v2029_v46  ;;  %1030 = vmatpush.bf16.msrb.mxu2 %v2053_v50  ;;  %v2196_v37 = vld [vmem:[#allocation2 + $0xc] sm:$0xf]  ;;  %v2245_v46 = vld [vmem:[#allocation2 + $0x194] sm:$0xf]  ;;  %v2619_v50 = vld [vmem:[%s2973_s4] ss:$0 sm:$0xff] }
  0xce   : > { %v482_v57 = vmax.f32 %v465_v55, 0.0  ;;  %v1934_v38 = vld [vmem:[#allocation2 + $0x28] sm:$0xf0]  ;;  %v2110_v41 = vld [vmem:[#allocation2 + $0x178] sm:$0xf0] }
  0xcf   : > { %v473_v34 = vmax.f32 %v443_v14, 0.0  ;;  %1080 = vmatpush.bf16.msrb.mxu3 %v2025_v48  ;;  %v1958_v14 = vld [vmem:[#allocation2 + $0x60] sm:$0xf0]  ;;  %v1937_v39 = vor.u32 %v2196_v37, %v1934_v38  ;;  %v2134_v48 = vld [vmem:[#allocation2 + $0x1b0] sm:$0xf0] }
  0xd0   : > { %v490_v59 = vpack.c.bf16 %v482_v57, %v481_v54  ;;  %v1961_v18 = vor.u32 %v2203_v13, %v1958_v14  ;;  %v2221_v37 = vld [vmem:[#allocation2 + $0xd4] sm:$0xf] }
  0xd1   : > { %1031 = vmatpush.bf16.msrb.mxu2 %v2021_v4  ;;  %1181 = vmatpush.bf16.msrb.mxu1 %v1937_v39  ;;  %v2174_v4 = vld [vmem:[#allocation2 + $0x1f8] sm:$0xf0]  ;;  %v2038_v39 = vld [vmem:[#allocation2 + $0xf0] sm:$0xf0] }
  0xd2   : > { %1921 = vmatmul.msk.bf16.gmra.mxu2 %vm527_vm2, %v490_v59  ;;  %v2629_v5 = vor.u32 %v2254_v3, %v2174_v4  ;;  %v2226_v3 = vld [vmem:[#allocation2 + $0xf4] sm:$0xf0] }
  0xd3   : > { %1081 = vmatpush.bf16.msrb.mxu3 %v1993_v56 }
  0xd4   : > { %v444_v21 = vpop.f32.mrf.mxu0 }
  0xd5   : > { %v445_v26 = vadd.f32 %v2590_v15, %v444_v21  ;;  %1032 = vmatpush.bf16.msrb.mxu2 %v1989_v10  ;;  %v1964_v21 = vld [vmem:[#allocation2 + $0x48] sm:$0xf]  ;;  %1370 = vmatpush.bf16.msra.mxu1 %v2629_v5 }
  0xd7   : > { %v474_v35 = vmax.f32 %v445_v26, 0.0  ;;  %1082 = vmatpush.bf16.msrb.mxu3 %v1961_v18  ;;  %v1965_v26 = vor.u32 %v2208_v23, %v1964_v21  ;;  %v2229_v18 = vld [vmem:[#allocation2 + $0x114] sm:$0xf]  ;;  %v2142_v23 = vld [vmem:[#allocation2 + $0x1b8] sm:$0xf0] }
  0xd8   : > { %v2073_v21 = vor.u32 %v2229_v18, %v2070_v20  ;;  %v1974_v18 = vld [vmem:[#allocation2 + $0x70] sm:$0xf0]  ;;  %v2046_v20 = vld [vmem:[#allocation2 + $0xf8] sm:$0xf0] }
  0xd9   : > { %v486_v43 = vpack.c.bf16 %v474_v35, %v473_v34  ;;  %1033 = vmatpush.bf16.msrb.mxu2 %v1957_v22  ;;  %v2200_v34 = vld [vmem:[#allocation2 + $0x24] sm:$0xf0]  ;;  %v1925_v35 = vor.u32 %v2199_v32, %v1924_v30  ;;  %v2246_v22 = vld [vmem:[#allocation2 + $0x19c] sm:$0xf] }
  0xda   : > { %v1933_v36 = vor.u32 %v2200_v34, %v1932_v33  ;;  %v2640_v24 = vor.u32 %v2246_v22, %v2142_v23  ;;  %v2012_v23 = vld [vmem:[#allocation2 + $0x98] sm:$0xf] }
  0xdb   : > { %1917 = vmatmul.msk.bf16.gmra.mxu1 %vm527_vm2, %v486_v43  ;;  %1083 = vmatpush.bf16.msrb.mxu3 %v1929_v31 }
  0xdc   : > { %v447_v49 = vpop.f32.mrf.mxu0  ;;  %1371 = vmatpush.bf16.msra.mxu1 %v2640_v24 }
  0xdd   : > { %v448_v58 = vadd.f32 %v2590_v15, %v447_v49  ;;  %1034 = vmatpush.bf16.msrb.mxu2 %v1925_v35  ;;  %v2137_v49 = vor.u32 %v2245_v46, %v2134_v48  ;;  %v2068_v35 = vld [vmem:[#allocation2 + $0x110] sm:$0xf]  ;;  %v2077_v46 = vor.u32 %v2234_v45, %v2076_v44  ;;  %v1980_v45 = vld [vmem:[#allocation2 + $0x58] sm:$0xf] }
  0xdf   : > { %v475_v62 = vmax.f32 %v448_v58, 0.0  ;;  %1272 = vmatpush.bf16.msra.mxu3 %v2169_v42  ;;  %v2041_v42 = vor.u32 %v2221_v37, %v2038_v39  ;;  %v2197_v37 = vld [vmem:[#allocation2 + $0x14] sm:$0xf] }
  0xe0   : > { %v1942_v39 = vld [vmem:[#allocation2 + $0x30] sm:$0xf0] }
  0xe1   : > { %1223 = vmatpush.bf16.msra.mxu2 %v2165_v47 }
  0xe3   : > { %1273 = vmatpush.bf16.msra.mxu3 %v2137_v49 }
  0xe4   : > { %v449_v60 = vpop.f32.mrf.mxu0 }
  0xe5   : > { %v450_v61 = vadd.f32 %v2590_v15, %v449_v60  ;;  %v2216_v15 = vld [vmem:[#allocation2 + $0xa4] sm:$0xf0] }
  0xe6   : > { %v1997_v16 = vor.u32 %v2216_v15, %v1996_v9 }
  0xe7   : > { %v476_v63 = vmax.f32 %v450_v61, 0.0  ;;  %v2132_v61 = vld [vmem:[#allocation2 + $0x190] sm:$0xf] }
  0xe8   : > { %1130 = vmatpush.bf16.msrb.mxu0 %v1997_v16  ;;  %v2100_v16 = vld [vmem:[#allocation2 + $0x150] sm:$0xf] }
  0xe9   : > { %v487_v0 = vpack.c.bf16 %v476_v63, %v475_v62  ;;  %v2249_v62 = vld [vmem:[#allocation2 + $0x1ac] sm:$0xf0]  ;;  %v2237_v63 = vld [vmem:[#allocation2 + $0x154] sm:$0xf]  ;;  %v2101_v19 = vor.u32 %v2241_v17, %v2100_v16 }
  0xea   : > { %v2105_v2 = vor.u32 %v2237_v63, %v2102_v1  ;;  %v2078_v63 = vld [vmem:[#allocation2 + $0x138] sm:$0xf0]  ;;  %v2205_v16 = vld [vmem:[#allocation2 + $0x54] sm:$0xf] }
  0xeb   : > { %1918 = vmatmul.msk.bf16.gmra.mxu1 %vm527_vm2, %v487_v0  ;;  %v2133_v0 = vor.u32 %v2249_v62, %v2132_v61  ;;  %v2006_v61 = vld [vmem:[#allocation2 + $0xb0] sm:$0xf0]  ;;  %v2230_v62 = vld [vmem:[#allocation2 + $0x11c] sm:$0xf] }
  0xec   : > { %1131 = vmatpush.bf16.msrb.mxu0 %v1965_v26  ;;  %1274 = vmatpush.bf16.msra.mxu3 %v2105_v2  ;;  %v2242_v26 = vld [vmem:[#allocation2 + $0x174] sm:$0xf0]  ;;  %v2662_v1 = vor.u32 %v2230_v62, %v2078_v63 }
  0xed   : > { %1224 = vmatpush.bf16.msra.mxu2 %v2133_v0  ;;  %v2109_v27 = vor.u32 %v2242_v26, %v2108_v25  ;;  %v2044_v2 = vld [vmem:[#allocation2 + $0xd8] sm:$0xf] }
  0xee   : > { %v2045_v4 = vor.u32 %v2226_v3, %v2044_v2  ;;  %v2218_v25 = vld [vmem:[#allocation2 + $0xb4] sm:$0xf0]  ;;  %v1950_v2 = vld [vmem:[#allocation2 + $0x38] sm:$0xf0] }
  0xef   : > { %v2013_v26 = vor.u32 %v2218_v25, %v2012_v23  ;;  %v2202_v63 = vld [vmem:[#allocation2 + $0x34] sm:$0xf0] }
  0xf0   : > { %1132 = vmatpush.bf16.msrb.mxu0 %v1933_v36  ;;  %1275 = vmatpush.bf16.msra.mxu3 %v2073_v21  ;;  %v2233_v36 = vld [vmem:[#allocation2 + $0x12c] sm:$0xf0]  ;;  %v1977_v21 = vor.u32 %v2205_v16, %v1974_v18 }
  0xf1   : > { %1225 = vmatpush.bf16.msra.mxu2 %v2101_v19  ;;  %v2069_v38 = vor.u32 %v2233_v36, %v2068_v35  ;;  %v2222_v19 = vld [vmem:[#allocation2 + $0xdc] sm:$0xf]  ;;  %v1972_v35 = vld [vmem:[#allocation2 + $0x50] sm:$0xf] }
  0xf2   : > { %v2673_v22 = vor.u32 %v2222_v19, %v2046_v20  ;;  %v2209_v36 = vld [vmem:[#allocation2 + $0x6c] sm:$0xf0] }
  0xf4   : > { %1321 = vmatpush.bf16.msra.mxu0 %v2173_v53  ;;  %1276 = vmatpush.bf16.msra.mxu3 %v2041_v42  ;;  %v1945_v42 = vor.u32 %v2197_v37, %v1942_v39 }
  0xf5   : > { %1226 = vmatpush.bf16.msra.mxu2 %v2069_v38  ;;  %v1973_v38 = vor.u32 %v2209_v36, %v1972_v35 }
  0xf8   : > { %1322 = vmatpush.bf16.msra.mxu0 %v2141_v8 }
  0xfc   : > { %1323 = vmatpush.bf16.msra.mxu0 %v2109_v27 }
 0x100   : > { %1324 = vmatpush.bf16.msra.mxu0 %v2077_v46  ;;  %v2210_v46 = vld [vmem:[#allocation2 + $0x74] sm:$0xf0] }
 0x104   : > { %1325 = vmatpush.bf16.msra.mxu0 %v2045_v4 }
 0x108   : > { %1326 = vmatpush.bf16.msra.mxu0 %v2013_v26 }
 0x128   : > { %v561_v43 = vpop.f32.mrf.mxu1 }
 0x129   : > { %v562_v54 = vadd.f32 %v2619_v50, %v561_v43  ;;  %v2651_v43 = vor.u32 %v2238_v40, %v2110_v41  ;;  %v2214_v40 = vld [vmem:[#allocation2 + $0x9c] sm:$0xf] }
 0x12a   : > { %v2014_v41 = vld [vmem:[#allocation2 + $0xb8] sm:$0xf0] }
 0x12b   : > { %v601_v57 = vmax.f32 %v562_v54, 0.0  ;;  %1372 = vmatpush.bf16.msra.mxu1 %v2651_v43  ;;  %v2017_v44 = vor.u32 %v2214_v40, %v2014_v41 }
 0x12f   : > { %1373 = vmatpush.bf16.msra.mxu1 %v2662_v1 }
 0x130   : > { %v563_v55 = vpop.f32.mrf.mxu1 }
 0x131   : > { %v564_v56 = vadd.f32 %v2619_v50, %v563_v55 }
 0x133   : > { %v602_v58 = vmax.f32 %v564_v56, 0.0  ;;  %v2036_v56 = vld [vmem:[#allocation2 + $0xd0] sm:$0xf]  ;;  %1374 = vmatpush.bf16.msra.mxu1 %v2673_v22 }
 0x135   : > { %v2623_v59 = vpack.c.bf16 %v602_v58, %v601_v57  ;;  %v586_v55 = vpop.f32.mrf.mxu2  ;;  %v2225_v57 = vld [vmem:[#allocation2 + $0xec] sm:$0xf0]  ;;  %v2213_v58 = vld [vmem:[#allocation2 + $0x94] sm:$0xf] }
 0x136   : > { %v2009_v0 = vor.u32 %v2213_v58, %v2006_v61  ;;  %v1940_v58 = vld [vmem:[#allocation2 + $0x10] sm:$0xf]  ;;  %v1948_v61 = vld [vmem:[#allocation2 + $0x18] sm:$0xf] }
 0x137   : > { %1035 = vmatmul.bf16.vlgmr.msrb.gmra.mxu2 %v2623_v59  ;;  %1084 = vmatmul.bf16.vlgmr.msrb.gmra.mxu3 %v2623_v59  ;;  %v1949_v3 = vor.u32 %v2202_v63, %v1948_v61 }
 0x138   : > { %1133 = vmatmul.bf16.vlgmr.msrb.gmra.mxu0 %v2623_v59  ;;  %1182 = vmatmul.bf16.vlgmr.msrb.gmra.mxu1 %v2623_v59  ;;  %v566_v60 = vpop.f32.mrf.mxu1 }
 0x139   : > { %v567_v9 = vadd.f32 %v2619_v50, %v566_v60  ;;  %v2037_v60 = vor.u32 %v2225_v57, %v2036_v56  ;;  %1277 = vmatpush.bf16.msra.mxu3 %v2009_v0  ;;  %1375 = vmatpush.bf16.msra.mxu1 %v2017_v44  ;;  %v2198_v0 = vld [vmem:[#allocation2 + $0x1c] sm:$0xf] }
 0x13a   : > { %v1953_v4 = vor.u32 %v2198_v0, %v1950_v2 }
 0x13b   : > { %v603_v11 = vmax.f32 %v567_v9, 0.0  ;;  %1227 = vmatpush.bf16.msra.mxu2 %v2037_v60  ;;  %v2201_v60 = vld [vmem:[#allocation2 + $0x2c] sm:$0xf0] }
 0x13c   : > { %v1941_v62 = vor.u32 %v2201_v60, %v1940_v58 }
 0x13d   : > { %v588_v9 = vpop.f32.mrf.mxu2  ;;  %1278 = vmatpush.bf16.msra.mxu3 %v1977_v21 }
 0x140   : > { %v568_v10 = vpop.f32.mrf.mxu1 }
 0x141   : > { %v569_v15 = vadd.f32 %v2619_v50, %v568_v10  ;;  %1279 = vmatpush.bf16.msra.mxu3 %v1945_v42 }
 0x143   : > { %v604_v12 = vmax.f32 %v569_v15, 0.0 }
 0x145   : > { %v2634_v13 = vpack.c.bf16 %v604_v12, %v603_v11  ;;  %v2004_v12 = vld [vmem:[#allocation2 + $0x90] sm:$0xf]  ;;  %v591_v27 = vpop.f32.mrf.mxu2  ;;  %2264 = vmatpush.bf16.msrb.mxu3 %v2629_v5 }
 0x147   : > { %1040 = vmatmul.bf16.gmra.mxu2 %v2634_v13  ;;  %1089 = vmatmul.bf16.gmra.mxu3 %v2634_v13 }
 0x148   : > { %1138 = vmatmul.bf16.gmra.mxu0 %v2634_v13  ;;  %1187 = vmatmul.bf16.gmra.mxu1 %v2634_v13  ;;  %v571_v14 = vpop.f32.mrf.mxu1 }
 0x149   : > { %v572_v28 = vadd.f32 %v2619_v50, %v571_v14  ;;  %v2217_v14 = vld [vmem:[#allocation2 + $0xac] sm:$0xf0]  ;;  %2265 = vmatpush.bf16.msrb.mxu3 %v2640_v24 }
 0x14a   : > { %v2005_v17 = vor.u32 %v2217_v14, %v2004_v12 }
 0x14b   : > { %v605_v31 = vmax.f32 %v572_v28, 0.0  ;;  %v587_v28 = vadd.f32 %v2619_v50, %v586_v55 }
 0x14c   : > { %1228 = vmatpush.bf16.msra.mxu2 %v2005_v17 }
 0x14d   : > { %2266 = vmatpush.bf16.msrb.mxu3 %v2651_v43 }
 0x150   : > { %v573_v29 = vpop.f32.mrf.mxu1  ;;  %1229 = vmatpush.bf16.msra.mxu2 %v1973_v38 }
 0x151   : > { %v574_v30 = vadd.f32 %v2619_v50, %v573_v29  ;;  %v589_v29 = vadd.f32 %v2619_v50, %v588_v9  ;;  %2267 = vmatpush.bf16.msrb.mxu3 %v2662_v1 }
 0x153   : > { %v606_v32 = vmax.f32 %v574_v30, 0.0  ;;  %v611_v30 = vmax.f32 %v587_v28, 0.0 }
 0x154   : > { %1230 = vmatpush.bf16.msra.mxu2 %v1941_v62 }
 0x155   : > { %v2645_v33 = vpack.c.bf16 %v606_v32, %v605_v31  ;;  %v612_v31 = vmax.f32 %v589_v29, 0.0  ;;  %2268 = vmatpush.bf16.msrb.mxu3 %v2673_v22 }
 0x157   : > { %1045 = vmatmul.bf16.gmra.mxu2 %v2645_v33  ;;  %1094 = vmatmul.bf16.gmra.mxu3 %v2645_v33  ;;  %v2678_v32 = vpack.c.bf16 %v612_v31, %v611_v30 }
 0x158   : > { %1143 = vmatmul.bf16.gmra.mxu0 %v2645_v33  ;;  %1192 = vmatmul.bf16.gmra.mxu1 %v2645_v33  ;;  %v576_v34 = vpop.f32.mrf.mxu1 }
 0x159   : > { %v577_v47 = vadd.f32 %v2619_v50, %v576_v34  ;;  %v593_v34 = vpop.f32.mrf.mxu2  ;;  %2269 = vmatpush.bf16.msrb.mxu3 %v2017_v44 }
 0x15b   : > { %v607_v51 = vmax.f32 %v577_v47, 0.0  ;;  %v2206_v47 = vld [vmem:[#allocation2 + $0x5c] sm:$0xf] }
 0x160   : > { %v578_v48 = vpop.f32.mrf.mxu1 }
 0x161   : > { %v579_v49 = vadd.f32 %v2619_v50, %v578_v48  ;;  %v1981_v48 = vor.u32 %v2210_v46, %v1980_v45  ;;  %v596_v55 = vpop.f32.mrf.mxu2 }
 0x162   : > { %v597_v24 = vadd.f32 %v2619_v50, %v596_v55 }
 0x163   : > { %v608_v52 = vmax.f32 %v579_v49, 0.0  ;;  %v1982_v49 = vld [vmem:[#allocation2 + $0x78] sm:$0xf0]  ;;  %1327 = vmatpush.bf16.msra.mxu0 %v1981_v48 }
 0x164   : > { %v615_v43 = vmax.f32 %v597_v24, 0.0 }
 0x165   : > { %v2656_v53 = vpack.c.bf16 %v608_v52, %v607_v51  ;;  %v1985_v51 = vor.u32 %v2206_v47, %v1982_v49  ;;  %v592_v52 = vadd.f32 %v2619_v50, %v591_v27 }
 0x167   : > { %1050 = vmatmul.bf16.gmra.mxu2 %v2656_v53  ;;  %1099 = vmatmul.bf16.gmra.mxu3 %v2656_v53  ;;  %v613_v56 = vmax.f32 %v592_v52, 0.0 }
 0x168   : > { %1148 = vmatmul.bf16.gmra.mxu0 %v2656_v53  ;;  %1197 = vmatmul.bf16.gmra.mxu1 %v2656_v53  ;;  %v581_v54 = vpop.f32.mrf.mxu1 }
 0x169   : > { %v582_v6 = vadd.f32 %v2619_v50, %v581_v54  ;;  %v594_v54 = vadd.f32 %v2619_v50, %v593_v34  ;;  %1376 = vmatpush.bf16.msra.mxu1 %v1985_v51  ;;  %1328 = vmatpush.bf16.msra.mxu0 %v1949_v3  ;;  %v598_v5 = vpop.f32.mrf.mxu2 }
 0x16a   : > { %2270 = vmatpush.bf16.msrb.mxu3 %v1985_v51 }
 0x16b   : > { %v609_v10 = vmax.f32 %v582_v6, 0.0  ;;  %v614_v57 = vmax.f32 %v594_v54, 0.0 }
 0x16d   : > { %v2688_v6 = vpack.c.bf16 %v614_v57, %v613_v56  ;;  %1377 = vmatpush.bf16.msra.mxu1 %v1953_v4 }
 0x16e   : > { %2271 = vmatpush.bf16.msrb.mxu3 %v1953_v4 }
 0x170   : > { %v583_v7 = vpop.f32.mrf.mxu1 }
 0x171   : > { %v584_v8 = vadd.f32 %v2619_v50, %v583_v7  ;;  %v599_v7 = vadd.f32 %v2619_v50, %v598_v5  ;;  %v2708_v50 = vld [vmem:[%s2975_s6] sm:$0xff] }
 0x172   : > { %v2716_v12 = vperm.slane %v2708_v50, 3  ;;  %v2723_v19 = vperm.slane %v2708_v50, 0  ;;  %v2726_v20 = vperm.slane %v2708_v50, 1 }
 0x173   : > { %v610_v15 = vmax.f32 %v584_v8, 0.0  ;;  %v616_v8 = vmax.f32 %v599_v7, 0.0 }
 0x175   : > { %v2667_v11 = vpack.c.bf16 %v610_v15, %v609_v10  ;;  %v2699_v9 = vpack.c.bf16 %v616_v8, %v615_v43  ;;  %v2713_v15 = vperm.slane %v2708_v50, 2 }
 0x177   : > { %1055 = vmatmul.bf16.gmra.mxu2 %v2667_v11  ;;  %1104 = vmatmul.bf16.gmra.mxu3 %v2667_v11 }
 0x178   : > { %1153 = vmatmul.bf16.gmra.mxu0 %v2667_v11  ;;  %1202 = vmatmul.bf16.gmra.mxu1 %v2667_v11 }
 0x187   : > { %1060 = vmatmul.bf16.gmra.mxu2 %v2678_v32  ;;  %1109 = vmatmul.bf16.gmra.mxu3 %v2678_v32 }
 0x188   : > { %1158 = vmatmul.bf16.gmra.mxu0 %v2678_v32  ;;  %1207 = vmatmul.bf16.gmra.mxu1 %v2678_v32 }
 0x197   : > { %1065 = vmatmul.bf16.gmra.mxu2 %v2688_v6  ;;  %1114 = vmatmul.bf16.gmra.mxu3 %v2688_v6 }
 0x198   : > { %1163 = vmatmul.bf16.gmra.mxu0 %v2688_v6  ;;  %1212 = vmatmul.bf16.gmra.mxu1 %v2688_v6 }
 0x1a7   : > { %1070 = vmatmul.bf16.gmra.mxu2 %v2699_v9  ;;  %1119 = vmatmul.bf16.gmra.mxu3 %v2699_v9 }
 0x1a8   : > { %1168 = vmatmul.bf16.gmra.mxu0 %v2699_v9  ;;  %1217 = vmatmul.bf16.gmra.mxu1 %v2699_v9 }
 0x1b5   : > { %v1134_v1 = vpop.f32.mrf.mxu0  ;;  %v1183_v10 = vpop.f32.mrf.mxu1 }
 0x1b6   : > { %v1135_v17 = vadd.f32 %v1134_v1, %v2713_v15  ;;  %v1184_v18 = vadd.f32 %v1183_v10, %v2716_v12 }
 0x1b7   : > { %1231 = vmatmul.bf16.vlgmr.msra.gmra.mxu2 %v2623_v59  ;;  %1280 = vmatmul.bf16.vlgmr.msra.gmra.mxu3 %v2623_v59 }
 0x1b8   : > { %1329 = vmatmul.bf16.vlgmr.msra.gmra.mxu0 %v2623_v59  ;;  %1378 = vmatmul.bf16.vlgmr.msra.gmra.mxu1 %v2623_v59  ;;  %v1421_v26 = vmax.f32 %v1135_v17, 0.0  ;;  %v1422_v59 = vmax.f32 %v1184_v18, 0.0 }
 0x1ba   : > { %v1036_v14 = vpop.f32.mrf.mxu2  ;;  %v1085_v16 = vpop.f32.mrf.mxu3 }
 0x1bb   : > { %v1037_v29 = vadd.f32 %v1036_v14, %v2723_v19  ;;  %v1086_v30 = vadd.f32 %v1085_v16, %v2726_v20 }
 0x1bd   : > { %v1136_v21 = vpop.f32.mrf.mxu0  ;;  %v1185_v22 = vpop.f32.mrf.mxu1  ;;  %v1419_v39 = vmax.f32 %v1037_v29, 0.0  ;;  %v1420_v40 = vmax.f32 %v1086_v30, 0.0 }
 0x1be   : > { %v1137_v23 = vadd.f32 %v1136_v21, %v2713_v15  ;;  %v1186_v25 = vadd.f32 %v1185_v22, %v2716_v12 }
 0x1c0   : > { %v1429_v27 = vmax.f32 %v1137_v23, 0.0  ;;  %v1430_v28 = vmax.f32 %v1186_v25, 0.0 }
 0x1c2   : > { %v1590_v31 = vmax.f32 %v1421_v26, %v1429_v27  ;;  %v1611_v34 = vmax.f32 %v1422_v59, %v1430_v28  ;;  %v1038_v35 = vpop.f32.mrf.mxu2  ;;  %v1087_v36 = vpop.f32.mrf.mxu3 }
 0x1c3   : > { %v1039_v37 = vadd.f32 %v1038_v35, %v2723_v19  ;;  %v1088_v38 = vadd.f32 %v1087_v36, %v2726_v20 }
 0x1c5   : > { %v1427_v41 = vmax.f32 %v1039_v37, 0.0  ;;  %v1428_v42 = vmax.f32 %v1088_v38, 0.0  ;;  %v1139_v44 = vpop.f32.mrf.mxu0  ;;  %v1188_v45 = vpop.f32.mrf.mxu1 }
 0x1c6   : > { %v1140_v46 = vadd.f32 %v1139_v44, %v2713_v15  ;;  %v1189_v47 = vadd.f32 %v1188_v45, %v2716_v12 }
 0x1c7   : > { %v1548_v48 = vmax.f32 %v1419_v39, %v1427_v41  ;;  %v1569_v49 = vmax.f32 %v1420_v40, %v1428_v42  ;;  %1236 = vmatmul.bf16.gmra.mxu2 %v2634_v13  ;;  %1285 = vmatmul.bf16.gmra.mxu3 %v2634_v13 }
 0x1c8   : > { %v1437_v51 = vmax.f32 %v1140_v46, 0.0  ;;  %v1438_v52 = vmax.f32 %v1189_v47, 0.0  ;;  %1334 = vmatmul.bf16.gmra.mxu0 %v2634_v13  ;;  %1383 = vmatmul.bf16.gmra.mxu1 %v2634_v13 }
 0x1ca   : > { %v1591_v54 = vmax.f32 %v1590_v31, %v1437_v51  ;;  %v1612_v55 = vmax.f32 %v1611_v34, %v1438_v52  ;;  %v1041_v56 = vpop.f32.mrf.mxu2  ;;  %v1090_v57 = vpop.f32.mrf.mxu3 }
 0x1cb   : > { %v1042_v58 = vadd.f32 %v1041_v56, %v2723_v19  ;;  %v1091_v60 = vadd.f32 %v1090_v57, %v2726_v20 }
 0x1cd   : > { %v1435_v61 = vmax.f32 %v1042_v58, 0.0  ;;  %v1436_v62 = vmax.f32 %v1091_v60, 0.0  ;;  %v1141_v63 = vpop.f32.mrf.mxu0  ;;  %v1190_v0 = vpop.f32.mrf.mxu1 }
 0x1ce   : > { %v1142_v2 = vadd.f32 %v1141_v63, %v2713_v15  ;;  %v1191_v3 = vadd.f32 %v1190_v0, %v2716_v12 }
 0x1cf   : > { %v1549_v4 = vmax.f32 %v1548_v48, %v1435_v61  ;;  %v1570_v5 = vmax.f32 %v1569_v49, %v1436_v62 }
 0x1d0   : > { %v1445_v24 = vmax.f32 %v1142_v2, 0.0  ;;  %v1446_v13 = vmax.f32 %v1191_v3, 0.0 }
 0x1d2   : > { %v1592_v7 = vmax.f32 %v1591_v54, %v1445_v24  ;;  %v1613_v43 = vmax.f32 %v1612_v55, %v1446_v13  ;;  %v1043_v8 = vpop.f32.mrf.mxu2  ;;  %v1092_v1 = vpop.f32.mrf.mxu3 }
 0x1d3   : > { %v1044_v10 = vadd.f32 %v1043_v8, %v2723_v19  ;;  %v1093_v14 = vadd.f32 %v1092_v1, %v2726_v20 }
 0x1d5   : > { %v1443_v16 = vmax.f32 %v1044_v10, 0.0  ;;  %v1444_v17 = vmax.f32 %v1093_v14, 0.0  ;;  %v1144_v18 = vpop.f32.mrf.mxu0  ;;  %v1193_v21 = vpop.f32.mrf.mxu1 }
 0x1d6   : > { %v1145_v22 = vadd.f32 %v1144_v18, %v2713_v15  ;;  %v1194_v23 = vadd.f32 %v1193_v21, %v2716_v12 }
 0x1d7   : > { %v1550_v25 = vmax.f32 %v1549_v4, %v1443_v16  ;;  %v1571_v26 = vmax.f32 %v1570_v5, %v1444_v17  ;;  %1241 = vmatmul.bf16.gmra.mxu2 %v2645_v33  ;;  %1290 = vmatmul.bf16.gmra.mxu3 %v2645_v33 }
 0x1d8   : > { %v1453_v59 = vmax.f32 %v1145_v22, 0.0  ;;  %v1454_v27 = vmax.f32 %v1194_v23, 0.0  ;;  %1339 = vmatmul.bf16.gmra.mxu0 %v2645_v33  ;;  %1388 = vmatmul.bf16.gmra.mxu1 %v2645_v33 }
 0x1da   : > { %v1593_v28 = vmax.f32 %v1592_v7, %v1453_v59  ;;  %v1614_v29 = vmax.f32 %v1613_v43, %v1454_v27  ;;  %v1046_v30 = vpop.f32.mrf.mxu2  ;;  %v1095_v31 = vpop.f32.mrf.mxu3 }
 0x1db   : > { %v1047_v34 = vadd.f32 %v1046_v30, %v2723_v19  ;;  %v1096_v35 = vadd.f32 %v1095_v31, %v2726_v20 }
 0x1dd   : > { %v1451_v36 = vmax.f32 %v1047_v34, 0.0  ;;  %v1452_v37 = vmax.f32 %v1096_v35, 0.0  ;;  %v1146_v38 = vpop.f32.mrf.mxu0  ;;  %v1195_v39 = vpop.f32.mrf.mxu1 }
 0x1de   : > { %v1147_v40 = vadd.f32 %v1146_v38, %v2713_v15  ;;  %v1196_v41 = vadd.f32 %v1195_v39, %v2716_v12 }
 0x1df   : > { %v1551_v42 = vmax.f32 %v1550_v25, %v1451_v36  ;;  %v1572_v44 = vmax.f32 %v1571_v26, %v1452_v37 }
 0x1e0   : > { %v1461_v45 = vmax.f32 %v1147_v40, 0.0  ;;  %v1462_v33 = vmax.f32 %v1196_v41, 0.0 }
 0x1e2   : > { %v1594_v46 = vmax.f32 %v1593_v28, %v1461_v45  ;;  %v1615_v47 = vmax.f32 %v1614_v29, %v1462_v33  ;;  %v1048_v48 = vpop.f32.mrf.mxu2  ;;  %v1097_v49 = vpop.f32.mrf.mxu3 }
 0x1e3   : > { %v1049_v51 = vadd.f32 %v1048_v48, %v2723_v19  ;;  %v1098_v52 = vadd.f32 %v1097_v49, %v2726_v20 }
 0x1e5   : > { %v1459_v54 = vmax.f32 %v1049_v51, 0.0  ;;  %v1460_v55 = vmax.f32 %v1098_v52, 0.0  ;;  %v1149_v56 = vpop.f32.mrf.mxu0  ;;  %v1198_v57 = vpop.f32.mrf.mxu1 }
 0x1e6   : > { %v1150_v58 = vadd.f32 %v1149_v56, %v2713_v15  ;;  %v1199_v60 = vadd.f32 %v1198_v57, %v2716_v12 }
 0x1e7   : > { %v1552_v61 = vmax.f32 %v1551_v42, %v1459_v54  ;;  %v1573_v62 = vmax.f32 %v1572_v44, %v1460_v55  ;;  %1246 = vmatmul.bf16.gmra.mxu2 %v2656_v53  ;;  %1295 = vmatmul.bf16.gmra.mxu3 %v2656_v53 }
 0x1e8   : > { %v1469_v63 = vmax.f32 %v1150_v58, 0.0  ;;  %v1470_v0 = vmax.f32 %v1199_v60, 0.0  ;;  %1344 = vmatmul.bf16.gmra.mxu0 %v2656_v53  ;;  %1393 = vmatmul.bf16.gmra.mxu1 %v2656_v53 }
 0x1ea   : > { %v1595_v2 = vmax.f32 %v1594_v46, %v1469_v63  ;;  %v1616_v3 = vmax.f32 %v1615_v47, %v1470_v0  ;;  %v1051_v4 = vpop.f32.mrf.mxu2  ;;  %v1100_v5 = vpop.f32.mrf.mxu3 }
 0x1eb   : > { %v1052_v24 = vadd.f32 %v1051_v4, %v2723_v19  ;;  %v1101_v13 = vadd.f32 %v1100_v5, %v2726_v20 }
 0x1ed   : > { %v1467_v7 = vmax.f32 %v1052_v24, 0.0  ;;  %v1468_v43 = vmax.f32 %v1101_v13, 0.0  ;;  %v1151_v8 = vpop.f32.mrf.mxu0  ;;  %v1200_v1 = vpop.f32.mrf.mxu1 }
 0x1ee   : > { %v1152_v10 = vadd.f32 %v1151_v8, %v2713_v15  ;;  %v1201_v14 = vadd.f32 %v1200_v1, %v2716_v12 }
 0x1ef   : > { %v1553_v16 = vmax.f32 %v1552_v61, %v1467_v7  ;;  %v1574_v17 = vmax.f32 %v1573_v62, %v1468_v43 }
 0x1f0   : > { %v1477_v18 = vmax.f32 %v1152_v10, 0.0  ;;  %v1478_v53 = vmax.f32 %v1201_v14, 0.0 }
 0x1f2   : > { %v1596_v21 = vmax.f32 %v1595_v2, %v1477_v18  ;;  %v1617_v22 = vmax.f32 %v1616_v3, %v1478_v53  ;;  %v1053_v23 = vpop.f32.mrf.mxu2  ;;  %v1102_v25 = vpop.f32.mrf.mxu3 }
 0x1f3   : > { %v1054_v26 = vadd.f32 %v1053_v23, %v2723_v19  ;;  %v1103_v59 = vadd.f32 %v1102_v25, %v2726_v20 }
 0x1f5   : > { %v1475_v27 = vmax.f32 %v1054_v26, 0.0  ;;  %v1476_v28 = vmax.f32 %v1103_v59, 0.0  ;;  %v1154_v29 = vpop.f32.mrf.mxu0  ;;  %v1203_v30 = vpop.f32.mrf.mxu1 }
 0x1f6   : > { %v1155_v31 = vadd.f32 %v1154_v29, %v2713_v15  ;;  %v1204_v34 = vadd.f32 %v1203_v30, %v2716_v12 }
 0x1f7   : > { %v1554_v35 = vmax.f32 %v1553_v16, %v1475_v27  ;;  %v1575_v36 = vmax.f32 %v1574_v17, %v1476_v28  ;;  %1251 = vmatmul.bf16.gmra.mxu2 %v2667_v11  ;;  %1300 = vmatmul.bf16.gmra.mxu3 %v2667_v11 }
 0x1f8   : > { %v1485_v37 = vmax.f32 %v1155_v31, 0.0  ;;  %v1486_v38 = vmax.f32 %v1204_v34, 0.0  ;;  %1349 = vmatmul.bf16.gmra.mxu0 %v2667_v11  ;;  %1398 = vmatmul.bf16.gmra.mxu1 %v2667_v11 }
 0x1fa   : > { %v1597_v39 = vmax.f32 %v1596_v21, %v1485_v37  ;;  %v1618_v40 = vmax.f32 %v1617_v22, %v1486_v38  ;;  %v1056_v41 = vpop.f32.mrf.mxu2  ;;  %v1105_v42 = vpop.f32.mrf.mxu3 }
 0x1fb   : > { %v1057_v44 = vadd.f32 %v1056_v41, %v2723_v19  ;;  %v1106_v45 = vadd.f32 %v1105_v42, %v2726_v20 }
 0x1fd   : > { %v1483_v33 = vmax.f32 %v1057_v44, 0.0  ;;  %v1484_v46 = vmax.f32 %v1106_v45, 0.0  ;;  %v1156_v47 = vpop.f32.mrf.mxu0  ;;  %v1205_v48 = vpop.f32.mrf.mxu1 }
 0x1fe   : > { %v1157_v49 = vadd.f32 %v1156_v47, %v2713_v15  ;;  %v1206_v51 = vadd.f32 %v1205_v48, %v2716_v12 }
 0x1ff   : > { %v1555_v52 = vmax.f32 %v1554_v35, %v1483_v33  ;;  %v1576_v54 = vmax.f32 %v1575_v36, %v1484_v46 }
 0x200   : > { %v1493_v55 = vmax.f32 %v1157_v49, 0.0  ;;  %v1494_v11 = vmax.f32 %v1206_v51, 0.0 }
 0x202   : > { %v1598_v56 = vmax.f32 %v1597_v39, %v1493_v55  ;;  %v1619_v57 = vmax.f32 %v1618_v40, %v1494_v11  ;;  %v1058_v58 = vpop.f32.mrf.mxu2  ;;  %v1107_v60 = vpop.f32.mrf.mxu3 }
 0x203   : > { %v1059_v61 = vadd.f32 %v1058_v58, %v2723_v19  ;;  %v1108_v62 = vadd.f32 %v1107_v60, %v2726_v20 }
 0x205   : > { %v1491_v63 = vmax.f32 %v1059_v61, 0.0  ;;  %v1492_v0 = vmax.f32 %v1108_v62, 0.0  ;;  %v1159_v2 = vpop.f32.mrf.mxu0  ;;  %v1208_v3 = vpop.f32.mrf.mxu1 }
 0x206   : > { %v1160_v4 = vadd.f32 %v1159_v2, %v2713_v15  ;;  %v1209_v5 = vadd.f32 %v1208_v3, %v2716_v12 }
 0x207   : > { %v1556_v24 = vmax.f32 %v1555_v52, %v1491_v63  ;;  %v1577_v13 = vmax.f32 %v1576_v54, %v1492_v0  ;;  %1256 = vmatmul.bf16.gmra.mxu2 %v2678_v32  ;;  %1305 = vmatmul.bf16.gmra.mxu3 %v2678_v32 }
 0x208   : > { %v1501_v7 = vmax.f32 %v1160_v4, 0.0  ;;  %v1502_v43 = vmax.f32 %v1209_v5, 0.0  ;;  %1354 = vmatmul.bf16.gmra.mxu0 %v2678_v32  ;;  %1403 = vmatmul.bf16.gmra.mxu1 %v2678_v32 }
 0x20a   : > { %v1599_v8 = vmax.f32 %v1598_v56, %v1501_v7  ;;  %v1620_v1 = vmax.f32 %v1619_v57, %v1502_v43  ;;  %v1061_v10 = vpop.f32.mrf.mxu2  ;;  %v1110_v14 = vpop.f32.mrf.mxu3 }
 0x20b   : > { %v1062_v16 = vadd.f32 %v1061_v10, %v2723_v19  ;;  %v1111_v17 = vadd.f32 %v1110_v14, %v2726_v20 }
 0x20d   : > { %v1499_v18 = vmax.f32 %v1062_v16, 0.0  ;;  %v1500_v53 = vmax.f32 %v1111_v17, 0.0  ;;  %v1161_v21 = vpop.f32.mrf.mxu0  ;;  %v1210_v22 = vpop.f32.mrf.mxu1 }
 0x20e   : > { %v1162_v23 = vadd.f32 %v1161_v21, %v2713_v15  ;;  %v1211_v25 = vadd.f32 %v1210_v22, %v2716_v12 }
 0x20f   : > { %v1557_v26 = vmax.f32 %v1556_v24, %v1499_v18  ;;  %v1578_v59 = vmax.f32 %v1577_v13, %v1500_v53 }
 0x210   : > { %v1509_v27 = vmax.f32 %v1162_v23, 0.0  ;;  %v1510_v32 = vmax.f32 %v1211_v25, 0.0 }
 0x212   : > { %v1600_v28 = vmax.f32 %v1599_v8, %v1509_v27  ;;  %v1621_v29 = vmax.f32 %v1620_v1, %v1510_v32  ;;  %v1063_v30 = vpop.f32.mrf.mxu2  ;;  %v1112_v31 = vpop.f32.mrf.mxu3 }
 0x213   : > { %v1064_v34 = vadd.f32 %v1063_v30, %v2723_v19  ;;  %v1113_v35 = vadd.f32 %v1112_v31, %v2726_v20 }
 0x215   : > { %v1507_v36 = vmax.f32 %v1064_v34, 0.0  ;;  %v1508_v37 = vmax.f32 %v1113_v35, 0.0  ;;  %v1164_v38 = vpop.f32.mrf.mxu0  ;;  %v1213_v39 = vpop.f32.mrf.mxu1 }
 0x216   : > { %v1165_v40 = vadd.f32 %v1164_v38, %v2713_v15  ;;  %v1214_v41 = vadd.f32 %v1213_v39, %v2716_v12 }
 0x217   : > { %v1558_v42 = vmax.f32 %v1557_v26, %v1507_v36  ;;  %v1579_v44 = vmax.f32 %v1578_v59, %v1508_v37  ;;  %1261 = vmatmul.bf16.gmra.mxu2 %v2688_v6  ;;  %1310 = vmatmul.bf16.gmra.mxu3 %v2688_v6 }
 0x218   : > { %v1517_v45 = vmax.f32 %v1165_v40, 0.0  ;;  %v1518_v33 = vmax.f32 %v1214_v41, 0.0  ;;  %1359 = vmatmul.bf16.gmra.mxu0 %v2688_v6  ;;  %1408 = vmatmul.bf16.gmra.mxu1 %v2688_v6 }
 0x21a   : > { %v1601_v46 = vmax.f32 %v1600_v28, %v1517_v45  ;;  %v1622_v47 = vmax.f32 %v1621_v29, %v1518_v33  ;;  %v1066_v48 = vpop.f32.mrf.mxu2  ;;  %v1115_v49 = vpop.f32.mrf.mxu3 }
 0x21b   : > { %v1067_v51 = vadd.f32 %v1066_v48, %v2723_v19  ;;  %v1116_v52 = vadd.f32 %v1115_v49, %v2726_v20 }
 0x21d   : > { %v1515_v54 = vmax.f32 %v1067_v51, 0.0  ;;  %v1516_v55 = vmax.f32 %v1116_v52, 0.0  ;;  %v1166_v11 = vpop.f32.mrf.mxu0  ;;  %v1215_v56 = vpop.f32.mrf.mxu1 }
 0x21e   : > { %v1167_v57 = vadd.f32 %v1166_v11, %v2713_v15  ;;  %v1216_v58 = vadd.f32 %v1215_v56, %v2716_v12 }
 0x21f   : > { %v1559_v60 = vmax.f32 %v1558_v42, %v1515_v54  ;;  %v1580_v61 = vmax.f32 %v1579_v44, %v1516_v55 }
 0x220   : > { %v1525_v62 = vmax.f32 %v1167_v57, 0.0  ;;  %v1526_v6 = vmax.f32 %v1216_v58, 0.0 }
 0x222   : > { %v1602_v63 = vmax.f32 %v1601_v46, %v1525_v62  ;;  %v1623_v0 = vmax.f32 %v1622_v47, %v1526_v6  ;;  %v1068_v2 = vpop.f32.mrf.mxu2  ;;  %v1117_v3 = vpop.f32.mrf.mxu3  ;;  %v2821_v46 = vperm.slane %v2708_v50, 7 }
 0x223   : > { %v1069_v4 = vadd.f32 %v1068_v2, %v2723_v19  ;;  %v1118_v5 = vadd.f32 %v1117_v3, %v2726_v20 }
 0x225   : > { %v1523_v24 = vmax.f32 %v1069_v4, 0.0  ;;  %v1524_v13 = vmax.f32 %v1118_v5, 0.0  ;;  %v1169_v7 = vpop.f32.mrf.mxu0  ;;  %v1218_v43 = vpop.f32.mrf.mxu1 }
 0x226   : > { %v1170_v8 = vadd.f32 %v1169_v7, %v2713_v15  ;;  %v1219_v1 = vadd.f32 %v1218_v43, %v2716_v12 }
 0x227   : > { %v1560_v10 = vmax.f32 %v1559_v60, %v1523_v24  ;;  %v1581_v14 = vmax.f32 %v1580_v61, %v1524_v13  ;;  %1266 = vmatmul.bf16.gmra.mxu2 %v2699_v9  ;;  %1315 = vmatmul.bf16.gmra.mxu3 %v2699_v9 }
 0x228   : > { %v1533_v16 = vmax.f32 %v1170_v8, 0.0  ;;  %v1534_v17 = vmax.f32 %v1219_v1, 0.0  ;;  %1364 = vmatmul.bf16.gmra.mxu0 %v2699_v9 }
 0x22a   : > { %v1603_v18 = vmax.f32 %v1602_v63, %v1533_v16  ;;  %v1624_v53 = vmax.f32 %v1623_v0, %v1534_v17  ;;  %v1071_v21 = vpop.f32.mrf.mxu2  ;;  %v1120_v22 = vpop.f32.mrf.mxu3  ;;  %v2827_v63 = vperm.slane %v2708_v50, 4  ;;  %v2830_v0 = vperm.slane %v2708_v50, 5 }
 0x22b   : > { %v1072_v23 = vadd.f32 %v1071_v21, %v2723_v19  ;;  %v1121_v25 = vadd.f32 %v1120_v22, %v2726_v20 }
 0x22d   : > { %v1531_v26 = vmax.f32 %v1072_v23, 0.0  ;;  %v1532_v59 = vmax.f32 %v1121_v25, 0.0  ;;  %v1171_v27 = vpop.f32.mrf.mxu0  ;;  %v1220_v32 = vpop.f32.mrf.mxu1 }
 0x22e   : > { %v1172_v28 = vadd.f32 %v1171_v27, %v2713_v15  ;;  %v1221_v29 = vadd.f32 %v1220_v32, %v2716_v12  ;;  %v2818_v15 = vperm.slane %v2708_v50, 6 }
 0x22f   : > { %v1561_v30 = vmax.f32 %v1560_v10, %v1531_v26  ;;  %v1582_v31 = vmax.f32 %v1581_v14, %v1532_v59 }
 0x230   : > { %v1541_v34 = vmax.f32 %v1172_v28, 0.0  ;;  %v1542_v35 = vmax.f32 %v1221_v29, 0.0 }
 0x232   : > { %v1604_v36 = vmax.f32 %v1603_v18, %v1541_v34  ;;  %v1625_v37 = vmax.f32 %v1624_v53, %v1542_v35  ;;  %v1073_v38 = vpop.f32.mrf.mxu2  ;;  %v1122_v39 = vpop.f32.mrf.mxu3 }
 0x233   : > { %v1074_v40 = vadd.f32 %v1073_v38, %v2723_v19  ;;  %v1123_v41 = vadd.f32 %v1122_v39, %v2726_v20 }
 0x234   : > { %v1605_v42 = vrot.slane %v1604_v36, 4  ;;  %v1626_v44 = vrot.slane %v1625_v37, 4 }
 0x235   : > { %v1539_v45 = vmax.f32 %v1074_v40, 0.0  ;;  %v1540_v33 = vmax.f32 %v1123_v41, 0.0  ;;  %v1330_v12 = vpop.f32.mrf.mxu0  ;;  %v1379_v47 = vpop.f32.mrf.mxu1 }
 0x236   : > { %v1606_v48 = vmax.f32 %v1604_v36, %v1605_v42  ;;  %v1627_v49 = vmax.f32 %v1625_v37, %v1626_v44  ;;  %v1331_v11 = vadd.f32 %v1330_v12, %v2818_v15  ;;  %v1380_v56 = vadd.f32 %v1379_v47, %v2821_v46 }
 0x237   : > { %v1562_v51 = vmax.f32 %v1561_v30, %v1539_v45  ;;  %v1583_v52 = vmax.f32 %v1582_v31, %v1540_v33  ;;  %1413 = vmatmul.bf16.vlgmr.msrb.gmra.mxu3 %v2699_v9 }
 0x238   : > { %v1607_v19 = vrot.slane %v1606_v48, 2  ;;  %v1628_v20 = vrot.slane %v1627_v49, 2  ;;  %v1425_v5 = vmax.f32 %v1331_v11, 0.0  ;;  %v1426_v24 = vmax.f32 %v1380_v56, 0.0 }
 0x239   : > { %v1563_v54 = vrot.slane %v1562_v51, 4  ;;  %v1584_v55 = vrot.slane %v1583_v52, 4 }
 0x23a   : > { %v1608_v57 = vmax.f32 %v1606_v48, %v1607_v19  ;;  %v1629_v58 = vmax.f32 %v1627_v49, %v1628_v20  ;;  %v1232_v60 = vpop.f32.mrf.mxu2  ;;  %v1281_v61 = vpop.f32.mrf.mxu3 }
 0x23b   : > { %v1564_v62 = vmax.f32 %v1562_v51, %v1563_v54  ;;  %v1585_v6 = vmax.f32 %v1583_v52, %v1584_v55  ;;  %v1233_v50 = vadd.f32 %v1232_v60, %v2827_v63  ;;  %v1282_v17 = vadd.f32 %v1281_v61, %v2830_v0 }
 0x23c   : > { %v1609_v9 = vrot.slane %v1608_v57, 1  ;;  %v1630_v2 = vrot.slane %v1629_v58, 1 }
 0x23d   : > { %v1565_v3 = vrot.slane %v1564_v62, 2  ;;  %v1586_v4 = vrot.slane %v1585_v6, 2  ;;  %v1332_v13 = vpop.f32.mrf.mxu0  ;;  %v1381_v7 = vpop.f32.mrf.mxu1  ;;  %v1423_v34 = vmax.f32 %v1233_v50, 0.0  ;;  %v1424_v35 = vmax.f32 %v1282_v17, 0.0 }
 0x23e   : > { %v1610_v43 = vmax.f32 %v1608_v57, %v1609_v9  ;;  %v1631_v8 = vmax.f32 %v1629_v58, %v1630_v2  ;;  %v1333_v1 = vadd.f32 %v1332_v13, %v2818_v15  ;;  %v1382_v10 = vadd.f32 %v1381_v7, %v2821_v46 }
 0x23f   : > { %v1566_v14 = vmax.f32 %v1564_v62, %v1565_v3  ;;  %v1587_v16 = vmax.f32 %v1585_v6, %v1586_v4 }
 0x240   : > { %v1725_v18 = vrot.slane %v1610_v43, 6  ;;  %v1726_v53 = vrot.slane %v1631_v8, 5  ;;  %v1433_v21 = vmax.f32 %v1333_v1, 0.0  ;;  %v1434_v22 = vmax.f32 %v1382_v10, 0.0 }
 0x241   : > { %v1567_v23 = vrot.slane %v1566_v14, 1  ;;  %v1588_v25 = vrot.slane %v1587_v16, 1 }
 0x242   : > { %v1734_v26 = vsel %vm1733_vm3, %v1725_v18, %v1726_v53  ;;  %v1674_v59 = vmax.f32 %v1425_v5, %v1433_v21  ;;  %v1695_v27 = vmax.f32 %v1426_v24, %v1434_v22  ;;  %v1234_v32 = vpop.f32.mrf.mxu2  ;;  %v1283_v28 = vpop.f32.mrf.mxu3 }
 0x243   : > { %v1589_v29 = vmax.f32 %v1587_v16, %v1588_v25  ;;  %v1235_v30 = vadd.f32 %v1234_v32, %v2827_v63  ;;  %v1284_v31 = vadd.f32 %v1283_v28, %v2830_v0  ;;  %v1568_v36 = vmax.f32 %v1566_v14, %v1567_v23 }
 0x245   : > { %v1724_v37 = vrot.slane %v1589_v29, 7  ;;  %v1431_v38 = vmax.f32 %v1235_v30, 0.0  ;;  %v1432_v39 = vmax.f32 %v1284_v31, 0.0  ;;  %v1335_v40 = vpop.f32.mrf.mxu0  ;;  %v1384_v41 = vpop.f32.mrf.mxu1 }
 0x246   : > { %v1336_v42 = vadd.f32 %v1335_v40, %v2818_v15  ;;  %v1385_v44 = vadd.f32 %v1384_v41, %v2821_v46 }
 0x247   : > { %v1732_v45 = vsel %vm1731_vm4, %v1568_v36, %v1724_v37  ;;  %v1632_v33 = vmax.f32 %v1423_v34, %v1431_v38  ;;  %v1653_v12 = vmax.f32 %v1424_v35, %v1432_v39 }
 0x248   : > { %v1441_v47 = vmax.f32 %v1336_v42, 0.0  ;;  %v1442_v48 = vmax.f32 %v1385_v44, 0.0  ;;  %v2841_v49 = vsel %vm1735_vm5, %v1732_v45, %v1734_v26 }
 0x24a   : > { %v1675_v51 = vmax.f32 %v1674_v59, %v1441_v47  ;;  %v2843_v52 = vmax.f32 %v1695_v27, %v1442_v48  ;;  %v1237_v19 = vpop.f32.mrf.mxu2  ;;  %v1286_v20 = vpop.f32.mrf.mxu3 }
 0x24b   : > { %v1238_v54 = vadd.f32 %v1237_v19, %v2827_v63  ;;  %v1287_v55 = vadd.f32 %v1286_v20, %v2830_v0 }
 0x24d   : > { %v1439_v11 = vmax.f32 %v1238_v54, 0.0  ;;  %v1440_v56 = vmax.f32 %v1287_v55, 0.0  ;;  %v1337_v57 = vpop.f32.mrf.mxu0  ;;  %v1386_v3 = vpop.f32.mrf.mxu1 }
 0x24e   : > { %v1338_v58 = vadd.f32 %v1337_v57, %v2818_v15 }
 0x24f   : > { %v1633_v60 = vmax.f32 %v1632_v33, %v1439_v11  ;;  %v1654_v61 = vmax.f32 %v1653_v12, %v1440_v56 }
 0x250   : > { %v1449_v62 = vmax.f32 %v1338_v58, 0.0 }
 0x252   : > { %v1676_v6 = vmax.f32 %v1675_v51, %v1449_v62  ;;  %v1239_v9 = vpop.f32.mrf.mxu2  ;;  %v1288_v2 = vpop.f32.mrf.mxu3 }
 0x253   : > { %v1240_v4 = vadd.f32 %v1239_v9, %v2827_v63  ;;  %v1289_v5 = vadd.f32 %v1288_v2, %v2830_v0 }
 0x255   : > { %v1447_v24 = vmax.f32 %v1240_v4, 0.0  ;;  %v1448_v13 = vmax.f32 %v1289_v5, 0.0  ;;  %v1340_v7 = vpop.f32.mrf.mxu0  ;;  %v1389_v53 = vpop.f32.mrf.mxu1  ;;  %v1387_v5 = vadd.f32 %v1386_v3, %v2821_v46 }
 0x256   : > { %v1341_v43 = vadd.f32 %v1340_v7, %v2818_v15 }
 0x257   : > { %v1634_v8 = vmax.f32 %v1633_v60, %v1447_v24  ;;  %v1655_v1 = vmax.f32 %v1654_v61, %v1448_v13 }
 0x258   : > { %v1457_v10 = vmax.f32 %v1341_v43, 0.0 }
 0x25a   : > { %v2851_v14 = vmax.f32 %v1676_v6, %v1457_v10  ;;  %v1242_v16 = vpop.f32.mrf.mxu2  ;;  %v1291_v50 = vpop.f32.mrf.mxu3 }
 0x25b   : > { %v1243_v17 = vadd.f32 %v1242_v16, %v2827_v63  ;;  %v1292_v18 = vadd.f32 %v1291_v50, %v2830_v0 }
 0x25d   : > { %v1455_v21 = vmax.f32 %v1243_v17, 0.0  ;;  %v1456_v22 = vmax.f32 %v1292_v18, 0.0  ;;  %v1342_v23 = vpop.f32.mrf.mxu0  ;;  %v1391_v30 = vpop.f32.mrf.mxu1  ;;  %v1450_v18 = vmax.f32 %v1387_v5, 0.0 }
 0x25e   : > { %v1343_v9 = vadd.f32 %v1342_v23, %v2818_v15 }
 0x25f   : > { %v1635_v25 = vmax.f32 %v1634_v8, %v1455_v21  ;;  %v1656_v26 = vmax.f32 %v1655_v1, %v1456_v22  ;;  %v1390_v8 = vadd.f32 %v1389_v53, %v2821_v46  ;;  %v1392_v21 = vadd.f32 %v1391_v30, %v2821_v46 }
 0x260   : > { %v1465_v1 = vmax.f32 %v1343_v9, 0.0  ;;  %v1697_v30 = vmax.f32 %v2843_v52, %v1450_v18 }
 0x262   : > { %v1244_v59 = vpop.f32.mrf.mxu2  ;;  %v1293_v27 = vpop.f32.mrf.mxu3  ;;  %v1678_v53 = vmax.f32 %v2851_v14, %v1465_v1 }
 0x263   : > { %v1294_v32 = vadd.f32 %v1293_v27, %v2830_v0  ;;  %v1245_v2 = vadd.f32 %v1244_v59, %v2827_v63  ;;  %v1458_v59 = vmax.f32 %v1390_v8, 0.0 }
 0x265   : > { %v1464_v28 = vmax.f32 %v1294_v32, 0.0  ;;  %v1345_v29 = vpop.f32.mrf.mxu0  ;;  %v1394_v40 = vpop.f32.mrf.mxu1  ;;  %v1463_v10 = vmax.f32 %v1245_v2, 0.0 }
 0x266   : > { %v1346_v7 = vadd.f32 %v1345_v29, %v2818_v15  ;;  %v1395_v27 = vadd.f32 %v1394_v40, %v2821_v46 }
 0x267   : > { %v1657_v31 = vmax.f32 %v1656_v26, %v1464_v28  ;;  %v1636_v28 = vmax.f32 %v1635_v25, %v1463_v10 }
 0x268   : > { %v1473_v3 = vmax.f32 %v1346_v7, 0.0  ;;  %v1474_v52 = vmax.f32 %v1395_v27, 0.0 }
 0x26a   : > { %v1247_v34 = vpop.f32.mrf.mxu2  ;;  %v1296_v35 = vpop.f32.mrf.mxu3 }
 0x26b   : > { %v1297_v36 = vadd.f32 %v1296_v35, %v2830_v0  ;;  %v1248_v43 = vadd.f32 %v1247_v34, %v2827_v63  ;;  %v1466_v35 = vmax.f32 %v1392_v21, 0.0 }
 0x26d   : > { %v1472_v37 = vmax.f32 %v1297_v36, 0.0  ;;  %v1347_v38 = vpop.f32.mrf.mxu0  ;;  %v2860_v51 = vpop.f32.mrf.mxu1  ;;  %v1471_v22 = vmax.f32 %v1248_v43, 0.0 }
 0x26e   : > { %v1348_v16 = vadd.f32 %v1347_v38, %v2818_v15 }
 0x26f   : > { %v1658_v39 = vmax.f32 %v1657_v31, %v1472_v37  ;;  %v1637_v14 = vmax.f32 %v1636_v28, %v1471_v22 }
 0x270   : > { %v1481_v29 = vmax.f32 %v1348_v16, 0.0 }
 0x272   : > { %v1249_v41 = vpop.f32.mrf.mxu2  ;;  %v1298_v42 = vpop.f32.mrf.mxu3 }
 0x273   : > { %v1299_v44 = vadd.f32 %v1298_v42, %v2830_v0  ;;  %v1250_v50 = vadd.f32 %v1249_v41, %v2827_v63  ;;  %v1679_v41 = vmax.f32 %v1678_v53, %v1473_v3 }
 0x275   : > { %v1480_v45 = vmax.f32 %v1299_v44, 0.0  ;;  %v1350_v33 = vpop.f32.mrf.mxu0  ;;  %v2862_v55 = vpop.f32.mrf.mxu1  ;;  %v1479_v31 = vmax.f32 %v1250_v50, 0.0  ;;  %v1698_v44 = vmax.f32 %v1697_v30, %v1458_v59 }
 0x276   : > { %v1351_v23 = vadd.f32 %v1350_v33, %v2818_v15 }
 0x277   : > { %v2858_v12 = vmax.f32 %v1658_v39, %v1480_v45 }
 0x278   : > { %v1489_v42 = vmax.f32 %v1351_v23, 0.0 }
 0x27a   : > { %v1252_v47 = vpop.f32.mrf.mxu2  ;;  %v1301_v48 = vpop.f32.mrf.mxu3 }
 0x27b   : > { %v1253_v26 = vadd.f32 %v1252_v47, %v2827_v63  ;;  %v1302_v32 = vadd.f32 %v1301_v48, %v2830_v0  ;;  %v1680_v48 = vmax.f32 %v1679_v41, %v1481_v29 }
 0x27d   : > { %v1352_v19 = vpop.f32.mrf.mxu0  ;;  %v2866_v60 = vpop.f32.mrf.mxu1  ;;  %v1487_v40 = vmax.f32 %v1253_v26, 0.0  ;;  %v1488_v45 = vmax.f32 %v1302_v32, 0.0  ;;  %v1681_v43 = vmax.f32 %v1680_v48, %v1489_v42 }
 0x27e   : > { %v1353_v34 = vadd.f32 %v1352_v19, %v2818_v15  ;;  %v1638_v19 = vmax.f32 %v1637_v14, %v1479_v31 }
 0x280   : > { %v1639_v8 = vmax.f32 %v1638_v19, %v1487_v40 }
 0x282   : > { %v1254_v20 = vpop.f32.mrf.mxu2  ;;  %v1303_v54 = vpop.f32.mrf.mxu3 }
 0x283   : > { %v1255_v36 = vadd.f32 %v1254_v20, %v2827_v63  ;;  %v1304_v37 = vadd.f32 %v1303_v54, %v2830_v0  ;;  %v1497_v20 = vmax.f32 %v1353_v34, 0.0  ;;  %v1699_v54 = vmax.f32 %v1698_v44, %v1466_v35 }
 0x284   : > { %v1397_v35 = vadd.f32 %v2860_v51, %v2821_v46 }
 0x285   : > { %v1355_v11 = vpop.f32.mrf.mxu0  ;;  %v2872_v4 = vpop.f32.mrf.mxu1  ;;  %v1495_v2 = vmax.f32 %v1255_v36, 0.0  ;;  %v1496_v5 = vmax.f32 %v1304_v37, 0.0  ;;  %v1700_v18 = vmax.f32 %v1699_v54, %v1474_v52  ;;  %v1682_v21 = vmax.f32 %v1681_v43, %v1497_v20 }
 0x286   : > { %v1356_v7 = vadd.f32 %v1355_v11, %v2818_v15  ;;  %v1482_v19 = vmax.f32 %v1397_v35, 0.0  ;;  %v1402_v20 = vadd.f32 %v2866_v60, %v2821_v46 }
 0x287   : > { %v1640_v11 = vmax.f32 %v1639_v8, %v1495_v2 }
 0x288   : > { %v1505_v26 = vmax.f32 %v1356_v7, 0.0 }
 0x28a   : > { %v1257_v56 = vpop.f32.mrf.mxu2  ;;  %v1306_v57 = vpop.f32.mrf.mxu3  ;;  %v1683_v36 = vmax.f32 %v1682_v21, %v1505_v26  ;;  %v1701_v21 = vmax.f32 %v1700_v18, %v1482_v19 }
 0x28b   : > { %v1258_v25 = vadd.f32 %v1257_v56, %v2827_v63  ;;  %v1307_v33 = vadd.f32 %v1306_v57, %v2830_v0  ;;  %v1660_v57 = vmax.f32 %v2858_v12, %v1488_v45 }
 0x28d   : > { %v2864_v58 = vpop.f32.mrf.mxu0  ;;  %v2894_v47 = vpop.f32.mrf.mxu1  ;;  %v1503_v10 = vmax.f32 %v1258_v25, 0.0  ;;  %v1504_v16 = vmax.f32 %v1307_v33, 0.0  ;;  %v1661_v23 = vmax.f32 %v1660_v57, %v1496_v5 }
 0x28e   : > { %v1358_v50 = vadd.f32 %v2864_v58, %v2818_v15 }
 0x28f   : > { %v1641_v32 = vmax.f32 %v1640_v11, %v1503_v10  ;;  %v1662_v28 = vmax.f32 %v1661_v23, %v1504_v16  ;;  %v1407_v11 = vadd.f32 %v2894_v47, %v2821_v46 }
 0x290   : > { %v1513_v29 = vmax.f32 %v1358_v50, 0.0 }
 0x292   : > { %v1259_v61 = vpop.f32.mrf.mxu2  ;;  %v1308_v62 = vpop.f32.mrf.mxu3  ;;  %v1684_v44 = vmax.f32 %v1683_v36, %v1513_v29 }
 0x293   : > { %v1260_v1 = vadd.f32 %v1259_v61, %v2827_v63  ;;  %v1309_v56 = vadd.f32 %v1308_v62, %v2830_v0 }
 0x295   : > { %v2868_v6 = vpop.f32.mrf.mxu0  ;;  %v1511_v12 = vmax.f32 %v1260_v1, 0.0  ;;  %v1512_v53 = vmax.f32 %v1309_v56, 0.0 }
 0x296   : > { %v1361_v61 = vadd.f32 %v2868_v6, %v2818_v15 }
 0x297   : > { %v1642_v41 = vmax.f32 %v1641_v32, %v1511_v12  ;;  %v1663_v14 = vmax.f32 %v1662_v28, %v1512_v53 }
 0x298   : > { %v1521_v37 = vmax.f32 %v1361_v61, 0.0 }
 0x29a   : > { %v1262_v24 = vpop.f32.mrf.mxu2  ;;  %v1311_v13 = vpop.f32.mrf.mxu3 }
 0x29b   : > { %v1263_v3 = vadd.f32 %v1262_v24, %v2827_v63  ;;  %v1312_v22 = vadd.f32 %v1311_v13, %v2830_v0 }
 0x29d   : > { %v2880_v17 = vpop.f32.mrf.mxu0  ;;  %v1519_v13 = vmax.f32 %v1263_v3, 0.0  ;;  %v1520_v31 = vmax.f32 %v1312_v22, 0.0  ;;  %v1498_v3 = vmax.f32 %v1402_v20, 0.0 }
 0x29e   : > { %v1363_v24 = vadd.f32 %v2880_v17, %v2818_v15  ;;  %v1400_v17 = vadd.f32 %v2862_v55, %v2821_v46 }
 0x29f   : > { %v1643_v33 = vmax.f32 %v1642_v41, %v1519_v13  ;;  %v1664_v52 = vmax.f32 %v1663_v14, %v1520_v31 }
 0x2a0   : > { %v1529_v45 = vmax.f32 %v1363_v24, 0.0  ;;  %v1490_v1 = vmax.f32 %v1400_v17, 0.0 }
 0x2a2   : > { %v1264_v38 = vpop.f32.mrf.mxu2  ;;  %v1313_v39 = vpop.f32.mrf.mxu3  ;;  %v1702_v26 = vmax.f32 %v1701_v21, %v1490_v1 }
 0x2a3   : > { %v1265_v27 = vadd.f32 %v1264_v38, %v2827_v63  ;;  %v1314_v58 = vadd.f32 %v1313_v39, %v2830_v0  ;;  %v1409_v38 = vpop.f32.mrf.mxu1 }
 0x2a4   : > { %v1703_v53 = vmax.f32 %v1702_v26, %v1498_v3 }
 0x2a5   : > { %v1365_v9 = vpop.f32.mrf.mxu0  ;;  %v1527_v42 = vmax.f32 %v1265_v27, 0.0  ;;  %v1528_v40 = vmax.f32 %v1314_v58, 0.0  ;;  %v1514_v58 = vmax.f32 %v1407_v11, 0.0 }
 0x2a6   : > { %v1366_v39 = vadd.f32 %v1365_v9, %v2818_v15  ;;  %v1685_v9 = vmax.f32 %v1684_v44, %v1521_v37 }
 0x2a7   : > { %v1644_v7 = vmax.f32 %v1643_v33, %v1527_v42  ;;  %v1665_v43 = vmax.f32 %v1664_v52, %v1528_v40 }
 0x2a8   : > { %v1537_v54 = vmax.f32 %v1366_v39, 0.0  ;;  %v1686_v56 = vmax.f32 %v1685_v9, %v1529_v45 }
 0x2aa   : > { %v1267_v62 = vpop.f32.mrf.mxu2  ;;  %v1316_v59 = vpop.f32.mrf.mxu3  ;;  %v1687_v22 = vmax.f32 %v1686_v56, %v1537_v54 }
 0x2ab   : > { %v1268_v34 = vadd.f32 %v1267_v62, %v2827_v63  ;;  %v1317_v6 = vadd.f32 %v1316_v59, %v2830_v0  ;;  %v1411_v61 = vpop.f32.mrf.mxu1 }
 0x2ac   : > { %v1412_v18 = vadd.f32 %v1411_v61, %v2821_v46 }
 0x2ad   : > { %v1367_v30 = vpop.f32.mrf.mxu0  ;;  %v1535_v48 = vmax.f32 %v1268_v34, 0.0  ;;  %v1536_v51 = vmax.f32 %v1317_v6, 0.0 }
 0x2ae   : > { %v1368_v25 = vadd.f32 %v1367_v30, %v2818_v15  ;;  %v1405_v15 = vadd.f32 %v2872_v4, %v2821_v46  ;;  %v1410_v4 = vadd.f32 %v1409_v38, %v2821_v46  ;;  %v1530_v30 = vmax.f32 %v1412_v18, 0.0 }
 0x2af   : > { %v1645_v10 = vmax.f32 %v1644_v7, %v1535_v48  ;;  %v1666_v16 = vmax.f32 %v1665_v43, %v1536_v51 }
 0x2b0   : > { %v1545_v57 = vmax.f32 %v1368_v25, 0.0  ;;  %v1522_v47 = vmax.f32 %v1410_v4, 0.0 }
 0x2b2   : > { %v1269_v2 = vpop.f32.mrf.mxu2  ;;  %v1318_v5 = vpop.f32.mrf.mxu3  ;;  %v1688_v62 = vmax.f32 %v1687_v22, %v1545_v57 }
 0x2b3   : > { %v1270_v55 = vadd.f32 %v1269_v2, %v2827_v63  ;;  %v1319_v8 = vadd.f32 %v1318_v5, %v2830_v0  ;;  %v1506_v0 = vmax.f32 %v1405_v15, 0.0 }
 0x2b4   : > { %v1689_v24 = vrot.slane %v1688_v62, 4 }
 0x2b5   : > { %v1543_v50 = vmax.f32 %v1270_v55, 0.0  ;;  %v1544_v60 = vmax.f32 %v1319_v8, 0.0  ;;  %v1704_v29 = vmax.f32 %v1703_v53, %v1506_v0 }
 0x2b6   : > { %v1690_v37 = vmax.f32 %v1688_v62, %v1689_v24 }
 0x2b7   : > { %v1646_v23 = vmax.f32 %v1645_v10, %v1543_v50  ;;  %v1667_v63 = vmax.f32 %v1666_v16, %v1544_v60  ;;  %v1705_v6 = vmax.f32 %v1704_v29, %v1514_v58 }
 0x2b8   : > { %v1691_v25 = vrot.slane %v1690_v37, 2 }
 0x2b9   : > { %v1647_v59 = vrot.slane %v1646_v23, 4  ;;  %v1668_v12 = vrot.slane %v1667_v63, 4  ;;  %v1706_v38 = vmax.f32 %v1705_v6, %v1522_v47 }
 0x2ba   : > { %v1414_v27 = vpop.f32.mrf.mxu3  ;;  %v1692_v9 = vmax.f32 %v1690_v37, %v1691_v25 }
 0x2bb   : > { %v1648_v32 = vmax.f32 %v1646_v23, %v1647_v59  ;;  %v1669_v28 = vmax.f32 %v1667_v63, %v1668_v12  ;;  %v1415_v34 = vadd.f32 %v1414_v27, %v2821_v46  ;;  %v1707_v40 = vmax.f32 %v1706_v38, %v1530_v30 }
 0x2bc   : > { %v1693_v5 = vrot.slane %v1692_v9, 1 }
 0x2bd   : > { %v1649_v13 = vrot.slane %v1648_v32, 2  ;;  %v1670_v31 = vrot.slane %v1669_v28, 2  ;;  %v1538_v14 = vmax.f32 %v1415_v34, 0.0 }
 0x2be   : > { %v1694_v55 = vmax.f32 %v1692_v9, %v1693_v5 }
 0x2bf   : > { %v1650_v35 = vmax.f32 %v1648_v32, %v1649_v13  ;;  %v1671_v36 = vmax.f32 %v1669_v28, %v1670_v31  ;;  %v1708_v48 = vmax.f32 %v1707_v40, %v1538_v14 }
 0x2c0   : > { %v1729_v1 = vrot.slane %v1694_v55, 2 }
 0x2c1   : > { %v1651_v39 = vrot.slane %v1650_v35, 1  ;;  %v1672_v41 = vrot.slane %v1671_v36, 1 }
 0x2c2   : > { %v1416_v42 = vpop.f32.mrf.mxu3 }
 0x2c3   : > { %v1652_v17 = vmax.f32 %v1650_v35, %v1651_v39  ;;  %v1673_v44 = vmax.f32 %v1671_v36, %v1672_v41  ;;  %v1417_v45 = vadd.f32 %v1416_v42, %v2821_v46 }
 0x2c5   : > { %v1727_v33 = vrot.slane %v1652_v17, 4  ;;  %v1728_v52 = vrot.slane %v1673_v44, 3  ;;  %v1546_v51 = vmax.f32 %v1417_v45, 0.0 }
 0x2c7   : > { %v1738_v19 = vsel %vm1737_vm6, %v1727_v33, %v1728_v52  ;;  %v1709_v20 = vmax.f32 %v1708_v48, %v1546_v51 }
 0x2c9   : > { %v1710_v54 = vrot.slane %v1709_v20, 4 }
 0x2cb   : > { %v1711_v2 = vmax.f32 %v1709_v20, %v1710_v54 }
 0x2cd   : > { %v1712_v7 = vrot.slane %v1711_v2, 2 }
 0x2cf   : > { %v1713_v43 = vmax.f32 %v1711_v2, %v1712_v7 }
 0x2d1   : > { %v1714_v8 = vrot.slane %v1713_v43, 1 }
 0x2d3   : > { %v1715_v46 = vmax.f32 %v1713_v43, %v1714_v8 }
 0x2d5   : > { %v1730_v15 = vrot.slane %v1715_v46, 1 }
 0x2d7   : > { %v1740_v56 = vsel %vm1739_vm7, %v1729_v1, %v1730_v15 }
 0x2d8   : > { %v1742_v57 = vsel %vm1741_vm8, %v1738_v19, %v1740_v56 }
 0x2d9   : > { %v1743_v10 = vsel %vm414_vm0, %v2841_v49, %v1742_v57 }
 0x2da   : > { %1746 = vst [vmem:[%s311_s23] sm:$0xff] %v1743_v10 }
 0x2db   : > { %2400 = shalt.err (!%p2397_p9)
}
 0x2dc   : > { %2276 = dma.vmem_to_hbm [thread:$0]  (%p2540_p4), %s1761_s30, 128, %s1763_s8, %s1748_s27  }
 0x2dd PF: > { %p2288_p10 = scmp.ge.s32.totalorder %s2455_s29, 2  ;;  %s1774_s17 = sand.u32 1, %s2435_s24  }
 0x2de   : > { %s1775_s21 = scalar_lea.sflag [#allocation4], %s1774_s17 }
 0x2df   : > { %p2283_p11 = pnand %p2288_p10, %p2547_p8 }
 0x2e1   : > { %p2284_p12 = pneg %p2283_p11 }
 0x2e3   : > { %2430 = dma.done.wait (%p2284_p12), %s1775_s21, 128  }
 0x2e4   : > { %2432 = vsyncadd (%p2284_p12), %s1775_s21, 4294967168  ;;  %s21_s29 = sadd.s32 1, %s2455_s29   ;;  %s2979_s24 = smov %s2439_s25 }
 0x2e5   : > { %p18_p13 = scmp.ge.s32.totalorder %s21_s29, 4   ;;  %s2980_s25 = smov %s2443_s26 }
 0x2e6   : > { %s2981_s26 = smov %s2553_s14  ;;  %s2982_s27 = smov %s2451_s28 }
 0x2e7   : > { %s2983_s28 = smov %s2985_s9  ;;  %20 = sbr.rel (!%p18_p13) target bundleno = 5 (0x5), region = 92 }
 0x2ec   :  { %1781 = vsyncpa [#allocation3], 1 }
 0x2ed   :  { %1783 = vsyncpa [#allocation3 + $0x1], 1 }
 0x2ee   :  { %1784 = vsyncpa [#allocation4], 1 }
 0x2ef   :  { %1786 = vsyncpa [#allocation4 + $0x1], 1 }

</bundles_post_ra>
